<compile_context>
chip_gen: v7x
topology: tpu7x:2x2x1
jax: 0.10.0
libtpu: 0.0.40
codegen_flags: <defaults>
</compile_context>

<pallas_src>
import functools

import jax
import jax.numpy as jnp
from jax.experimental import pallas as pl
from jax.experimental.pallas import tpu as pltpu


# Hidden sizes of the 'deep' variant.
DIMS = [15, 128, 256, 512, 256, 128, 1]
F_PAD = 16  # padded input-feature dim (zero-padded from 15)


def _round_up(a, m):
    return (a + m - 1) // m * m


def _mlp_kernel(x_ref,
                w1, b1, w2, b2, w3, b3, w4, b4, w5, b5, w6, b6,
                o_ref):
    """Fused 6-layer MLP on one batch tile. All operands resident in VMEM.

    Weights are bf16, activations are cast to bf16 right before each MXU dot,
    accumulation / bias add / ReLU are f32.
    """
    h = x_ref[...].astype(jnp.float32)

    # Layers 1..5: Linear + (Dropout == identity in eval) + ReLU.
    # Python loop -> fully unrolled at trace time (6 static layers).
    for w_ref, b_ref in ((w1, b1), (w2, b2), (w3, b3), (w4, b4), (w5, b5)):
        h = jnp.dot(h.astype(jnp.bfloat16), w_ref[...],
                    preferred_element_type=jnp.float32)
        h = jnp.maximum(h + b_ref[...], 0.0)

    # Final layer: Linear(128, 1), no activation.
    out = jnp.dot(h.astype(jnp.bfloat16), w6[...],
                  preferred_element_type=jnp.float32) + b6[...]
    o_ref[...] = out.astype(o_ref.dtype)


def init_params(key):
    """Deterministic init mimicking nn.Linear defaults (U(-1/sqrt(fan_in), +))."""
    params = []
    for i in range(len(DIMS) - 1):
        fan_in, fan_out = DIMS[i], DIMS[i + 1]
        kw, kb, key = jax.random.split(key, 3)
        bound = 1.0 / (fan_in ** 0.5)
        # Stored as (in, out) so the kernel does x @ W.
        w = jax.random.uniform(kw, (fan_in, fan_out), jnp.float32, -bound, bound)
        b = jax.random.uniform(kb, (1, fan_out), jnp.float32, -bound, bound)
        params.append((w, b))
    return params


@functools.partial(jax.jit, static_argnames=("block_b",))
def regressor_forward(x, params, block_b=512):
    """x: (B, 15) float32 -> (B, 1) float32."""
    B, F = x.shape
    assert F == DIMS[0]
    assert block_b % 128 == 0 and block_b >= 128

    # Adaptive batch tile:
    #  - never larger than needed for small batches,
    #  - capped so large batches produce >= 2 grid steps (v7x: 2 TCs/chip can
    #    then split the "parallel" batch axis).
    block_b_eff = min(block_b, max(128, _round_up(pl.cdiv(B, 2), 128)))
    B_pad = _round_up(B, block_b_eff)

    # Pad batch to a tile multiple and features 15 -> 16 (zeros).
    x_p = jnp.pad(x.astype(jnp.float32), ((0, B_pad - B), (0, F_PAD - F)))

    # Flatten params: weights cast to bf16 (MXU operands), w1 zero-padded to
    # (16, 128) to match the padded feature dim; biases stay f32.
    flat_params = []
    for i, (w, b) in enumerate(params):
        if i == 0:
            w = jnp.pad(w, ((0, F_PAD - F), (0, 0)))
        flat_params += [w.astype(jnp.bfloat16), b.astype(jnp.float32)]

    # x / out tiled over the batch; every weight & bias is a single full block
    # with a constant index_map so it stays resident in VMEM across the grid
    # (no per-step re-DMA).
    x_spec = pl.BlockSpec((block_b_eff, F_PAD), lambda i: (i, 0))
    param_specs = [pl.BlockSpec(p.shape, lambda i: (0, 0)) for p in flat_params]
    out_spec = pl.BlockSpec((block_b_eff, DIMS[-1]), lambda i: (i, 0))

    # Advisory cost estimate for the XLA scheduler.
    macs_per_row = sum(DIMS[i] * DIMS[i + 1] for i in range(len(DIMS) - 1))
    param_bytes = sum(int(p.size) * p.dtype.itemsize for p in flat_params)
    cost = pl.CostEstimate(
        flops=2 * B_pad * macs_per_row,
        transcendentals=0,
        bytes_accessed=int(x_p.size) * 4 + B_pad * DIMS[-1] * 4 + param_bytes,
    )

    out = pl.pallas_call(
        _mlp_kernel,
        out_shape=jax.ShapeDtypeStruct((B_pad, DIMS[-1]), jnp.float32),
        grid_spec=pltpu.PrefetchScalarGridSpec(
            num_scalar_prefetch=0,
            grid=(B_pad // block_b_eff,),
            in_specs=[x_spec] + param_specs,
            out_specs=out_spec,
        ),
        compiler_params=pltpu.CompilerParams(
            dimension_semantics=("parallel",),
            vmem_limit_bytes=32 * 1024 * 1024,
        ),
        cost_estimate=cost,
    )(x_p, *flat_params)

    return out[:B]


def _reference_forward_f32(x, params):
    h = x.astype(jnp.float32)
    n = len(params)
    for i, (w, b) in enumerate(params):
        h = h @ w + b
        if i < n - 1:
            h = jnp.maximum(h, 0.0)
    return h


def _reference_forward_bf16(x, params):
    """Matches the kernel's numerics: bf16 operands, f32 accumulate/bias/ReLU."""
    h = x.astype(jnp.float32)
    n = len(params)
    for i, (w, b) in enumerate(params):
        h = jnp.dot(h.astype(jnp.bfloat16), w.astype(jnp.bfloat16),
                    preferred_element_type=jnp.float32) + b
        if i < n - 1:
            h = jnp.maximum(h, 0.0)
    return h


if __name__ == "__main__":
    key = jax.random.PRNGKey(0)
    k_x, k_p = jax.random.split(key)

    B = 200  # small ragged batch: pads to 256 and runs 2 grid steps of 128
    x = jax.random.normal(k_x, (B, DIMS[0]), dtype=jnp.float32)
    params = init_params(k_p)

    y = regressor_forward(x, params, block_b=512)
    y = jax.block_until_ready(y)
    assert y.shape == (B, 1)

    # Tight check vs. a reference using the same bf16-matmul/f32-accumulate math.
    y_ref_bf16 = _reference_forward_bf16(x, params)
    assert jnp.allclose(y, y_ref_bf16, atol=1e-3, rtol=1e-3), \
        "mismatch vs bf16-matched reference"

    # Loose check vs. the full-f32 reference (expected small bf16 drift).
    y_ref_f32 = _reference_forward_f32(x, params)
    assert jnp.allclose(y, y_ref_f32, atol=1e-1, rtol=1e-1), \
        "mismatch vs f32 reference beyond expected bf16 drift"

    print("KERNEL_OK")
</pallas_src>

<mosaic_0001>
module attributes {stable_mosaic.version = 11 : i64} {
  func.func @_mlp_kernel(%arg0: i32, %arg1: memref<128x16xf32, #tpu.memory_space<vmem>>, %arg2: memref<16x128xbf16, #tpu.memory_space<vmem>>, %arg3: memref<1x128xf32, #tpu.memory_space<vmem>>, %arg4: memref<128x256xbf16, #tpu.memory_space<vmem>>, %arg5: memref<1x256xf32, #tpu.memory_space<vmem>>, %arg6: memref<256x512xbf16, #tpu.memory_space<vmem>>, %arg7: memref<1x512xf32, #tpu.memory_space<vmem>>, %arg8: memref<512x256xbf16, #tpu.memory_space<vmem>>, %arg9: memref<1x256xf32, #tpu.memory_space<vmem>>, %arg10: memref<256x128xbf16, #tpu.memory_space<vmem>>, %arg11: memref<1x128xf32, #tpu.memory_space<vmem>>, %arg12: memref<128x1xbf16, #tpu.memory_space<vmem>>, %arg13: memref<1x1xf32, #tpu.memory_space<vmem>>, %arg14: memref<128x1xf32, #tpu.memory_space<vmem>>) attributes {dimension_semantics = [#tpu.dimension_semantics<parallel>], iteration_bounds = array<i64: 2>, scalar_prefetch = 0 : i64, scratch_operands = 0 : i64, tpu.core_type = #tpu.core_type<tc>, window_params = [{transform_indices = @transform_0, window_bounds = array<i64: 128, 16>}, {pipeline_mode = #tpu.pipeline_mode<synchronous>, transform_indices = @transform_1, window_bounds = array<i64: 16, 128>}, {pipeline_mode = #tpu.pipeline_mode<synchronous>, transform_indices = @transform_2, window_bounds = array<i64: 1, 128>}, {pipeline_mode = #tpu.pipeline_mode<synchronous>, transform_indices = @transform_3, window_bounds = array<i64: 128, 256>}, {pipeline_mode = #tpu.pipeline_mode<synchronous>, transform_indices = @transform_4, window_bounds = array<i64: 1, 256>}, {pipeline_mode = #tpu.pipeline_mode<synchronous>, transform_indices = @transform_5, window_bounds = array<i64: 256, 512>}, {pipeline_mode = #tpu.pipeline_mode<synchronous>, transform_indices = @transform_6, window_bounds = array<i64: 1, 512>}, {pipeline_mode = #tpu.pipeline_mode<synchronous>, transform_indices = @transform_7, window_bounds = array<i64: 512, 256>}, {pipeline_mode = #tpu.pipeline_mode<synchronous>, transform_indices = @transform_8, window_bounds = array<i64: 1, 256>}, {pipeline_mode = #tpu.pipeline_mode<synchronous>, transform_indices = @transform_9, window_bounds = array<i64: 256, 128>}, {pipeline_mode = #tpu.pipeline_mode<synchronous>, transform_indices = @transform_10, window_bounds = array<i64: 1, 128>}, {pipeline_mode = #tpu.pipeline_mode<synchronous>, transform_indices = @transform_11, window_bounds = array<i64: 128, 1>}, {pipeline_mode = #tpu.pipeline_mode<synchronous>, transform_indices = @transform_12, window_bounds = array<i64: 1, 1>}, {transform_indices = @transform_13, window_bounds = array<i64: 128, 1>}]} {
    %c0 = arith.constant 0 : index
    %c0_0 = arith.constant 0 : index
    %0 = vector.load %arg1[%c0, %c0_0] : memref<128x16xf32, #tpu.memory_space<vmem>>, vector<128x16xf32>
    %1 = arith.truncf %0 : vector<128x16xf32> to vector<128x16xbf16>
    %c0_1 = arith.constant 0 : index
    %c0_2 = arith.constant 0 : index
    %2 = vector.load %arg2[%c0_1, %c0_2] : memref<16x128xbf16, #tpu.memory_space<vmem>>, vector<16x128xbf16>
    %cst = arith.constant dense<0.000000e+00> : vector<128x128xf32>
    %3 = tpu.matmul %1, %2, %cst {dimension_numbers = #tpu.dot_dimension_numbers<[1], [0], [0], [1], [0, 0, 1, 1], [], []>} : vector<128x16xbf16>, vector<16x128xbf16>, vector<128x128xf32> -> vector<128x128xf32>
    %c0_3 = arith.constant 0 : index
    %c0_4 = arith.constant 0 : index
    %4 = vector.load %arg3[%c0_3, %c0_4] : memref<1x128xf32, #tpu.memory_space<vmem>>, vector<1x128xf32>
    %5 = vector.broadcast %4 : vector<1x128xf32> to vector<128x128xf32>
    %6 = arith.addf %3, %5 : vector<128x128xf32>
    %cst_5 = arith.constant 0.000000e+00 : f32
    %7 = vector.broadcast %cst_5 : f32 to vector<128x128xf32>
    %8 = arith.maximumf %6, %7 : vector<128x128xf32>
    %9 = arith.truncf %8 : vector<128x128xf32> to vector<128x128xbf16>
    %c0_6 = arith.constant 0 : index
    %c0_7 = arith.constant 0 : index
    %10 = vector.load %arg4[%c0_6, %c0_7] : memref<128x256xbf16, #tpu.memory_space<vmem>>, vector<128x256xbf16>
    %cst_8 = arith.constant dense<0.000000e+00> : vector<128x256xf32>
    %11 = tpu.matmul %9, %10, %cst_8 {dimension_numbers = #tpu.dot_dimension_numbers<[1], [0], [0], [1], [0, 0, 1, 1], [], []>} : vector<128x128xbf16>, vector<128x256xbf16>, vector<128x256xf32> -> vector<128x256xf32>
    %c0_9 = arith.constant 0 : index
    %c0_10 = arith.constant 0 : index
    %12 = vector.load %arg5[%c0_9, %c0_10] : memref<1x256xf32, #tpu.memory_space<vmem>>, vector<1x256xf32>
    %13 = vector.broadcast %12 : vector<1x256xf32> to vector<128x256xf32>
    %14 = arith.addf %11, %13 : vector<128x256xf32>
    %cst_11 = arith.constant 0.000000e+00 : f32
    %15 = vector.broadcast %cst_11 : f32 to vector<128x256xf32>
    %16 = arith.maximumf %14, %15 : vector<128x256xf32>
    %17 = arith.truncf %16 : vector<128x256xf32> to vector<128x256xbf16>
    %c0_12 = arith.constant 0 : index
    %c0_13 = arith.constant 0 : index
    %18 = vector.load %arg6[%c0_12, %c0_13] : memref<256x512xbf16, #tpu.memory_space<vmem>>, vector<256x512xbf16>
    %cst_14 = arith.constant dense<0.000000e+00> : vector<128x512xf32>
    %19 = tpu.matmul %17, %18, %cst_14 {dimension_numbers = #tpu.dot_dimension_numbers<[1], [0], [0], [1], [0, 0, 1, 1], [], []>} : vector<128x256xbf16>, vector<256x512xbf16>, vector<128x512xf32> -> vector<128x512xf32>
    %c0_15 = arith.constant 0 : index
    %c0_16 = arith.constant 0 : index
    %20 = vector.load %arg7[%c0_15, %c0_16] : memref<1x512xf32, #tpu.memory_space<vmem>>, vector<1x512xf32>
    %21 = vector.broadcast %20 : vector<1x512xf32> to vector<128x512xf32>
    %22 = arith.addf %19, %21 : vector<128x512xf32>
    %cst_17 = arith.constant 0.000000e+00 : f32
    %23 = vector.broadcast %cst_17 : f32 to vector<128x512xf32>
    %24 = arith.maximumf %22, %23 : vector<128x512xf32>
    %25 = arith.truncf %24 : vector<128x512xf32> to vector<128x512xbf16>
    %c0_18 = arith.constant 0 : index
    %c0_19 = arith.constant 0 : index
    %26 = vector.load %arg8[%c0_18, %c0_19] : memref<512x256xbf16, #tpu.memory_space<vmem>>, vector<512x256xbf16>
    %cst_20 = arith.constant dense<0.000000e+00> : vector<128x256xf32>
    %27 = tpu.matmul %25, %26, %cst_20 {dimension_numbers = #tpu.dot_dimension_numbers<[1], [0], [0], [1], [0, 0, 1, 1], [], []>} : vector<128x512xbf16>, vector<512x256xbf16>, vector<128x256xf32> -> vector<128x256xf32>
    %c0_21 = arith.constant 0 : index
    %c0_22 = arith.constant 0 : index
    %28 = vector.load %arg9[%c0_21, %c0_22] : memref<1x256xf32, #tpu.memory_space<vmem>>, vector<1x256xf32>
    %29 = vector.broadcast %28 : vector<1x256xf32> to vector<128x256xf32>
    %30 = arith.addf %27, %29 : vector<128x256xf32>
    %cst_23 = arith.constant 0.000000e+00 : f32
    %31 = vector.broadcast %cst_23 : f32 to vector<128x256xf32>
    %32 = arith.maximumf %30, %31 : vector<128x256xf32>
    %33 = arith.truncf %32 : vector<128x256xf32> to vector<128x256xbf16>
    %c0_24 = arith.constant 0 : index
    %c0_25 = arith.constant 0 : index
    %34 = vector.load %arg10[%c0_24, %c0_25] : memref<256x128xbf16, #tpu.memory_space<vmem>>, vector<256x128xbf16>
    %cst_26 = arith.constant dense<0.000000e+00> : vector<128x128xf32>
    %35 = tpu.matmul %33, %34, %cst_26 {dimension_numbers = #tpu.dot_dimension_numbers<[1], [0], [0], [1], [0, 0, 1, 1], [], []>} : vector<128x256xbf16>, vector<256x128xbf16>, vector<128x128xf32> -> vector<128x128xf32>
    %c0_27 = arith.constant 0 : index
    %c0_28 = arith.constant 0 : index
    %36 = vector.load %arg11[%c0_27, %c0_28] : memref<1x128xf32, #tpu.memory_space<vmem>>, vector<1x128xf32>
    %37 = vector.broadcast %36 : vector<1x128xf32> to vector<128x128xf32>
    %38 = arith.addf %35, %37 : vector<128x128xf32>
    %cst_29 = arith.constant 0.000000e+00 : f32
    %39 = vector.broadcast %cst_29 : f32 to vector<128x128xf32>
    %40 = arith.maximumf %38, %39 : vector<128x128xf32>
    %41 = arith.truncf %40 : vector<128x128xf32> to vector<128x128xbf16>
    %c0_30 = arith.constant 0 : index
    %c0_31 = arith.constant 0 : index
    %42 = vector.load %arg12[%c0_30, %c0_31] : memref<128x1xbf16, #tpu.memory_space<vmem>>, vector<128x1xbf16>
    %cst_32 = arith.constant dense<0.000000e+00> : vector<128x1xf32>
    %43 = tpu.matmul %41, %42, %cst_32 {dimension_numbers = #tpu.dot_dimension_numbers<[1], [0], [0], [1], [0, 0, 1, 1], [], []>} : vector<128x128xbf16>, vector<128x1xbf16>, vector<128x1xf32> -> vector<128x1xf32>
    %c0_33 = arith.constant 0 : index
    %c0_34 = arith.constant 0 : index
    %44 = vector.load %arg13[%c0_33, %c0_34] : memref<1x1xf32, #tpu.memory_space<vmem>>, vector<1x1xf32>
    %45 = vector.broadcast %44 : vector<1x1xf32> to vector<128x1xf32>
    %46 = arith.addf %43, %45 : vector<128x1xf32>
    %c0_35 = arith.constant 0 : index
    %c0_36 = arith.constant 0 : index
    %47 = vector.load %arg14[%c0_35, %c0_36] : memref<128x1xf32, #tpu.memory_space<vmem>>, vector<128x1xf32>
    tpu.vector_store %arg14[%c0_35, %c0_36], %46 {strides = array<i32>} : memref<128x1xf32, #tpu.memory_space<vmem>>, vector<128x1xf32>,
    return
  }
  func.func @transform_0(%arg0: i32) -> (i32, i32) {
    %c0_i32 = arith.constant 0 : i32
    %c0_i32_0 = arith.constant 0 : i32
    return %arg0, %c0_i32 : i32, i32
  }
  func.func @transform_1(%arg0: i32) -> (i32, i32) {
    %c0_i32 = arith.constant 0 : i32
    %c0_i32_0 = arith.constant 0 : i32
    %c0_i32_1 = arith.constant 0 : i32
    return %c0_i32, %c0_i32_0 : i32, i32
  }
  func.func @transform_2(%arg0: i32) -> (i32, i32) {
    %c0_i32 = arith.constant 0 : i32
    %c0_i32_0 = arith.constant 0 : i32
    %c0_i32_1 = arith.constant 0 : i32
    return %c0_i32, %c0_i32_0 : i32, i32
  }
  func.func @transform_3(%arg0: i32) -> (i32, i32) {
    %c0_i32 = arith.constant 0 : i32
    %c0_i32_0 = arith.constant 0 : i32
    %c0_i32_1 = arith.constant 0 : i32
    return %c0_i32, %c0_i32_0 : i32, i32
  }
  func.func @transform_4(%arg0: i32) -> (i32, i32) {
    %c0_i32 = arith.constant 0 : i32
    %c0_i32_0 = arith.constant 0 : i32
    %c0_i32_1 = arith.constant 0 : i32
    return %c0_i32, %c0_i32_0 : i32, i32
  }
  func.func @transform_5(%arg0: i32) -> (i32, i32) {
    %c0_i32 = arith.constant 0 : i32
    %c0_i32_0 = arith.constant 0 : i32
    %c0_i32_1 = arith.constant 0 : i32
    return %c0_i32, %c0_i32_0 : i32, i32
  }
  func.func @transform_6(%arg0: i32) -> (i32, i32) {
    %c0_i32 = arith.constant 0 : i32
    %c0_i32_0 = arith.constant 0 : i32
    %c0_i32_1 = arith.constant 0 : i32
    return %c0_i32, %c0_i32_0 : i32, i32
  }
  func.func @transform_7(%arg0: i32) -> (i32, i32) {
    %c0_i32 = arith.constant 0 : i32
    %c0_i32_0 = arith.constant 0 : i32
    %c0_i32_1 = arith.constant 0 : i32
    return %c0_i32, %c0_i32_0 : i32, i32
  }
  func.func @transform_8(%arg0: i32) -> (i32, i32) {
    %c0_i32 = arith.constant 0 : i32
    %c0_i32_0 = arith.constant 0 : i32
    %c0_i32_1 = arith.constant 0 : i32
    return %c0_i32, %c0_i32_0 : i32, i32
  }
  func.func @transform_9(%arg0: i32) -> (i32, i32) {
    %c0_i32 = arith.constant 0 : i32
    %c0_i32_0 = arith.constant 0 : i32
    %c0_i32_1 = arith.constant 0 : i32
    return %c0_i32, %c0_i32_0 : i32, i32
  }
  func.func @transform_10(%arg0: i32) -> (i32, i32) {
    %c0_i32 = arith.constant 0 : i32
    %c0_i32_0 = arith.constant 0 : i32
    %c0_i32_1 = arith.constant 0 : i32
    return %c0_i32, %c0_i32_0 : i32, i32
  }
  func.func @transform_11(%arg0: i32) -> (i32, i32) {
    %c0_i32 = arith.constant 0 : i32
    %c0_i32_0 = arith.constant 0 : i32
    %c0_i32_1 = arith.constant 0 : i32
    return %c0_i32, %c0_i32_0 : i32, i32
  }
  func.func @transform_12(%arg0: i32) -> (i32, i32) {
    %c0_i32 = arith.constant 0 : i32
    %c0_i32_0 = arith.constant 0 : i32
    %c0_i32_1 = arith.constant 0 : i32
    return %c0_i32, %c0_i32_0 : i32, i32
  }
  func.func @transform_13(%arg0: i32) -> (i32, i32) {
    %c0_i32 = arith.constant 0 : i32
    %c0_i32_0 = arith.constant 0 : i32
    return %arg0, %c0_i32 : i32, i32
  }
}

</mosaic_0001>

<bundles_post_ra>
// kernel: regressor_forward.1
= control target key start
LH: loop header
LB: loop body
LE: loop exit
PB: predicated region body
PF: predicated region fallthrough
CT: control target
= control target key end

     0   :  { %s3522_s27 = smov 0   ;;  %s4371_s0 = inlined_call_operand.vmem [shape: f32[256,16], index: 0, kind: input, shape index: {}]   ;;  %s4372_s1 = inlined_call_operand.vmem [shape: bf16[16,128], index: 1, kind: input, shape index: {}]   ;;  %s4373_s2 = inlined_call_operand.vmem [shape: f32[1,128], index: 2, kind: input, shape index: {}]   ;;  %s4374_s3 = inlined_call_operand.vmem [shape: bf16[128,256], index: 3, kind: input, shape index: {}]   ;;  %s4375_s4 = inlined_call_operand.vmem [shape: f32[1,256], index: 4, kind: input, shape index: {}]   ;;  %s4376_s5 = inlined_call_operand.vmem [shape: bf16[256,512], index: 5, kind: input, shape index: {}]   ;;  %s4377_s6 = inlined_call_operand.vmem [shape: f32[1,512], index: 6, kind: input, shape index: {}]   ;;  %s4378_s7 = inlined_call_operand.vmem [shape: bf16[512,256], index: 7, kind: input, shape index: {}]   ;;  %s4379_s8 = inlined_call_operand.vmem [shape: f32[1,256], index: 8, kind: input, shape index: {}]   ;;  %s4380_s9 = inlined_call_operand.vmem [shape: bf16[256,128], index: 9, kind: input, shape index: {}]   ;;  %s4381_s10 = inlined_call_operand.vmem [shape: f32[1,128], index: 10, kind: input, shape index: {}]   ;;  %s4382_s11 = inlined_call_operand.vmem [shape: bf16[128,1], index: 11, kind: input, shape index: {}]   ;;  %s4383_s12 = inlined_call_operand.<no memory space> [shape: f32[1,1], index: 12, kind: input, shape index: {}]   ;;  %s4384_s13 = inlined_call_operand.vmem [shape: f32[256,1], index: 13, kind: output, shape index: {}]  }
   0x1   :  { %v18_v0 = vstv %s4383_s12 }
   0x2   :  { %19 = vst [vmem:[#allocation2] sm:$0x1] %v18_v0 }
   0x3 LB: > { %s2796_s28 = sadd.s32 4294967295, %s3446_s27   ;;  %p2800_p0 = scmp.ge.s32.totalorder %s3446_s27, 1  ;;  %s3446_s27 = sphi %s3522_s27, %s25_s27  }
   0x4   : > { %p390_p1 = scmp.lt.s32.totalorder %s3446_s27, 3 }
   0x6   : > { %p391_p2 = pnand %p2800_p0, %p390_p1 }
   0x7   : > { %v3199_v1 = vld [vmem:[%s4372_s1] sm:$0xff] (!%p391_p2)   ;;  %s2801_s12 = sshll.u32 (!%p391_p2), %s2796_s28, 4  ;;  %v3203_v4 = vld [vmem:[%s4374_s3 + $0x14] ss:$8 sps:$4 sm:$0xff] (!%p391_p2)   ;;  %v3205_v5 = vld [vmem:[%s4374_s3 + $0x10] ss:$8 sps:$4 sm:$0xff] (!%p391_p2)  }
   0x8   : > { %394 = sbr.rel (%p391_p2) target bundleno = 1470 (0x5be), region = 72  ;;  %p435_p3 = scmp.lt.s32.totalorder (!%p391_p2), %s2801_s12, 31  ;;  %v3200_v2 = vld [vmem:[%s4374_s3 + $0x4] ss:$8 sps:$4 sm:$0xff] (!%p391_p2)   ;;  %3076 = vmatprep.subr.bf16.mxu0 (!%p391_p2), %v3199_v1  ;;  %v3202_v3 = vld [vmem:[%s4374_s3] ss:$8 sps:$4 sm:$0xff] (!%p391_p2)  }
   0x9   : > { %3077 = vmatpush3.bf16.msra.mxu0 (!%p391_p2), %v3199_v1  ;;  %740 = vmatprep.subr.bf16.mxu1 (!%p391_p2), %v3200_v2  ;;  %v3206_v6 = vld [vmem:[%s4374_s3 + $0x24] ss:$8 sps:$4 sm:$0xff] (!%p391_p2)   ;;  %v3208_v7 = vld [vmem:[%s4374_s3 + $0x20] ss:$8 sps:$4 sm:$0xff] (!%p391_p2)   ;;  %vm486_vm0 = vcmask (!%p391_p2), 130048   ;;  %v3448_v42 = vmov (!%p391_p2), 0  }
   0xa   : > { %741 = vmatpush1.bf16.msra.mxu1 (!%p391_p2), %v3202_v3  ;;  %v3209_v17 = vld [vmem:[%s4374_s3 + $0x34] ss:$8 sps:$4 sm:$0xff] (!%p391_p2)   ;;  %v3211_v19 = vld [vmem:[%s4374_s3 + $0x30] ss:$8 sps:$4 sm:$0xff] (!%p391_p2)   ;;  %v3212_v23 = vld [vmem:[%s4374_s3 + $0x44] ss:$8 sps:$4 sm:$0xff] (!%p391_p2)   ;;  %772 = vmatprep.mubr.bf16.mxu1 (!%p391_p2), %v3448_v42 }
   0xb   : > { %742 = vmatprep.subr.bf16.mxu1 (!%p391_p2), %v3203_v4  ;;  %v3214_v24 = vld [vmem:[%s4374_s3 + $0x40] ss:$8 sps:$4 sm:$0xff] (!%p391_p2)   ;;  %v3215_v26 = vld [vmem:[%s4374_s3 + $0x54] ss:$8 sps:$4 sm:$0xff] (!%p391_p2)   ;;  %v3217_v30 = vld [vmem:[%s4374_s3 + $0x50] ss:$8 sps:$4 sm:$0xff] (!%p391_p2)  }
   0xc   : > { %v3218_v38 = vld [vmem:[%s4374_s3 + $0x64] ss:$8 sps:$4 sm:$0xff] (!%p391_p2)   ;;  %v3220_v39 = vld [vmem:[%s4374_s3 + $0x60] ss:$8 sps:$4 sm:$0xff] (!%p391_p2)   ;;  %v3221_v40 = vld [vmem:[%s4374_s3 + $0x74] ss:$8 sps:$4 sm:$0xff] (!%p391_p2)  }
   0xd   : > { %v3223_v41 = vld [vmem:[%s4374_s3 + $0x70] ss:$8 sps:$4 sm:$0xff] (!%p391_p2)   ;;  %v3226_v44 = vld [vmem:[%s4376_s5 + $0x4] ss:$16 sps:$4 sm:$0xff] (!%p391_p2)   ;;  %v3229_v45 = vld [vmem:[%s4376_s5 + $0xc] ss:$16 sps:$4 sm:$0xff] (!%p391_p2)  }
   0xe   : > { %743 = vmatpush1.bf16.msra.mxu1 (!%p391_p2), %v3205_v5  ;;  %v3224_v43 = vld [vmem:[%s4376_s5] ss:$16 sps:$4 sm:$0xff] (!%p391_p2)   ;;  %v3232_v46 = vld [vmem:[%s4376_s5 + $0x24] ss:$16 sps:$4 sm:$0xff] (!%p391_p2)   ;;  %1307 = vmatprep.subr.bf16.mxu0 (!%p391_p2), %v3226_v44  ;;  %v3247_v44 = vld [vmem:[%s4376_s5 + $0x6c] ss:$16 sps:$4 sm:$0xff] (!%p391_p2)  }
   0xf   : > { %s4386_s12 = smov (!%p435_p3, %s2801_s12), 31  ;;  %744 = vmatprep.subr.bf16.mxu1 %v3206_v6  ;;  %v3230_v47 = vld [vmem:[%s4376_s5 + $0x20] ss:$16 sps:$4 sm:$0xff]   ;;  %v3238_v48 = vld [vmem:[%s4376_s5 + $0x44] ss:$16 sps:$4 sm:$0xff]   ;;  %vm2723_vm1 = vcmask 7168  }
  0x10   : > { %s2802_s22 = sshll.u32 %s4386_s12, 3  ;;  %v3236_v49 = vld [vmem:[%s4376_s5 + $0x40] ss:$16 sps:$4 sm:$0xff]   ;;  %v3244_v50 = vld [vmem:[%s4376_s5 + $0x64] ss:$16 sps:$4 sm:$0xff]  }
  0x11   : > { %s3556_s28 = scalar_lea.vmem %s4371_s0, %s2802_s22  ;;  %v3242_v51 = vld [vmem:[%s4376_s5 + $0x60] ss:$16 sps:$4 sm:$0xff]   ;;  %v3250_v52 = vld [vmem:[%s4376_s5 + $0x84] ss:$16 sps:$4 sm:$0xff]   ;;  %s4334_s20 = scalar_lea.vmem %s4384_s13, %s2802_s22 }
  0x12   : > { %v447_v8 = vld [vmem:[%s3556_s28] sm:$0xff]  ;;  %v448_v9 = vld [vmem:[%s3556_s28 + $0x8] sm:$0xff]  ;;  %v449_v10 = vld [vmem:[%s3556_s28 + $0x10] sm:$0xff]  ;;  %745 = vmatpush1.bf16.msra.mxu1 %v3208_v7 }
  0x13   : > { %v463_v11 = vpack.c.bf16 %v448_v9, %v447_v8  ;;  %v450_v12 = vld [vmem:[%s3556_s28 + $0x18] sm:$0xff]  ;;  %v451_v13 = vld [vmem:[%s3556_s28 + $0x20] sm:$0xff]  ;;  %v452_v14 = vld [vmem:[%s3556_s28 + $0x28] sm:$0xff]  ;;  %746 = vmatprep.subr.bf16.mxu1 %v3209_v17 }
  0x14   : > { %v464_v15 = vpack.c.bf16 %v450_v12, %v449_v10  ;;  %v465_v16 = vpack.c.bf16 %v452_v14, %v451_v13  ;;  %v453_v18 = vld [vmem:[%s3556_s28 + $0x30] sm:$0xff]  ;;  %v454_v20 = vld [vmem:[%s3556_s28 + $0x38] sm:$0xff]  ;;  %v455_v21 = vld [vmem:[%s3556_s28 + $0x40] sm:$0xff] }
  0x15   : > { %3078 = vmatprep.mubr.msk.bf16.mxu0 %vm486_vm0, %v463_v11  ;;  %v456_v22 = vld [vmem:[%s3556_s28 + $0x48] sm:$0xff]  ;;  %v466_v25 = vpack.c.bf16 %v454_v20, %v453_v18  ;;  %v457_v28 = vld [vmem:[%s3556_s28 + $0x50] sm:$0xff]  ;;  %v458_v29 = vld [vmem:[%s3556_s28 + $0x58] sm:$0xff] }
  0x16   : > { %3079 = vmatmul.mubr.msk.bf16.vlgmr.msra.gmra.mrb[0].mxu0 %vm486_vm0, %v464_v15  ;;  %v467_v27 = vpack.c.bf16 %v456_v22, %v455_v21  ;;  %747 = vmatpush1.bf16.msra.mxu1 %v3211_v19  ;;  %v459_v31 = vld [vmem:[%s3556_s28 + $0x60] sm:$0xff]  ;;  %v460_v32 = vld [vmem:[%s3556_s28 + $0x68] sm:$0xff]  ;;  %v468_v33 = vpack.c.bf16 %v458_v29, %v457_v28  ;;  %v461_v35 = vld [vmem:[%s3556_s28 + $0x70] sm:$0xff] }
  0x17   : > { %3082 = vmatprep.mubr.msk.bf16.mxu0 %vm486_vm0, %v465_v16  ;;  %748 = vmatprep.subr.bf16.mxu1 %v3212_v23  ;;  %v469_v34 = vpack.c.bf16 %v460_v32, %v459_v31  ;;  %v462_v36 = vld [vmem:[%s3556_s28 + $0x78] sm:$0xff]  ;;  %v3248_v53 = vld [vmem:[%s4376_s5 + $0x80] ss:$16 sps:$4 sm:$0xff]   ;;  %v3256_v54 = vld [vmem:[%s4376_s5 + $0xa4] ss:$16 sps:$4 sm:$0xff]  }
  0x18   : > { %v470_v37 = vpack.c.bf16 %v462_v36, %v461_v35  ;;  %1308 = vmatpush1.bf16.msra.mxu0 %v3224_v43  ;;  %v3254_v55 = vld [vmem:[%s4376_s5 + $0xa0] ss:$16 sps:$4 sm:$0xff]   ;;  %v3262_v56 = vld [vmem:[%s4376_s5 + $0xc4] ss:$16 sps:$4 sm:$0xff]   ;;  %v3227_v22 = vld [vmem:[%s4376_s5 + $0x8] ss:$16 sps:$4 sm:$0xff]  }
  0x19   : > { %1309 = vmatprep.subr.bf16.mxu0 %v3232_v46  ;;  %v3260_v57 = vld [vmem:[%s4376_s5 + $0xc0] ss:$16 sps:$4 sm:$0xff]   ;;  %v3268_v58 = vld [vmem:[%s4376_s5 + $0xe4] ss:$16 sps:$4 sm:$0xff]   ;;  %v3241_v36 = vld [vmem:[%s4376_s5 + $0x4c] ss:$16 sps:$4 sm:$0xff]  }
  0x1a   : > { %749 = vmatpush1.bf16.msra.mxu1 %v3214_v24  ;;  %v3266_v59 = vld [vmem:[%s4376_s5 + $0xe0] ss:$16 sps:$4 sm:$0xff]   ;;  %v3274_v60 = vld [vmem:[%s4376_s5 + $0x104] ss:$16 sps:$4 sm:$0xff]  }
  0x1b   : > { %750 = vmatprep.subr.bf16.mxu1 %v3215_v26  ;;  %v3272_v61 = vld [vmem:[%s4376_s5 + $0x100] ss:$16 sps:$4 sm:$0xff]   ;;  %v3280_v62 = vld [vmem:[%s4376_s5 + $0x124] ss:$16 sps:$4 sm:$0xff]  }
  0x1c   : > { %1310 = vmatpush1.bf16.msra.mxu0 %v3230_v47  ;;  %v3278_v63 = vld [vmem:[%s4376_s5 + $0x120] ss:$16 sps:$4 sm:$0xff]   ;;  %v3286_v0 = vld [vmem:[%s4376_s5 + $0x144] ss:$16 sps:$4 sm:$0xff]  }
  0x1d   : > { %1311 = vmatprep.subr.bf16.mxu0 %v3238_v48  ;;  %v3284_v1 = vld [vmem:[%s4376_s5 + $0x140] ss:$16 sps:$4 sm:$0xff]   ;;  %v3292_v2 = vld [vmem:[%s4376_s5 + $0x164] ss:$16 sps:$4 sm:$0xff]  }
  0x1e   : > { %3083 = vmatmul.mubr.msk.bf16.gmra.mrb[4].mxu0 %vm486_vm0, %v466_v25  ;;  %751 = vmatpush1.bf16.msra.mxu1 %v3217_v30  ;;  %v3290_v3 = vld [vmem:[%s4376_s5 + $0x160] ss:$16 sps:$4 sm:$0xff]   ;;  %v3298_v4 = vld [vmem:[%s4376_s5 + $0x184] ss:$16 sps:$4 sm:$0xff]   ;;  %v3235_v25 = vld [vmem:[%s4376_s5 + $0x2c] ss:$16 sps:$4 sm:$0xff]  }
  0x1f   : > { %3086 = vmatprep.mubr.msk.bf16.mxu0 %vm486_vm0, %v467_v27  ;;  %752 = vmatprep.subr.bf16.mxu1 %v3218_v38  ;;  %v3296_v5 = vld [vmem:[%s4376_s5 + $0x180] ss:$16 sps:$4 sm:$0xff]   ;;  %v3304_v6 = vld [vmem:[%s4376_s5 + $0x1a4] ss:$16 sps:$4 sm:$0xff]  }
  0x20   : > { %1312 = vmatpush1.bf16.msra.mxu0 %v3236_v49  ;;  %v3302_v7 = vld [vmem:[%s4376_s5 + $0x1a0] ss:$16 sps:$4 sm:$0xff]  }
  0x21   : > { %1313 = vmatprep.subr.bf16.mxu0 %v3244_v50  ;;  %v3706_v8 = vld [vmem:[%s4373_s2] ss:$0 sm:$0xff] }
  0x22   : > { %753 = vmatpush1.bf16.msra.mxu1 %v3220_v39 }
  0x23   : > { %754 = vmatprep.subr.bf16.mxu1 %v3221_v40  ;;  %v3239_v40 = vld [vmem:[%s4376_s5 + $0x48] ss:$16 sps:$4 sm:$0xff]  }
  0x24   : > { %1314 = vmatpush1.bf16.msra.mxu0 %v3242_v51 }
  0x25   : > { %1315 = vmatprep.subr.bf16.mxu0 %v3250_v52  ;;  %v3245_v52 = vld [vmem:[%s4376_s5 + $0x68] ss:$16 sps:$4 sm:$0xff]  }
  0x26   : > { %3087 = vmatmul.mubr.msk.bf16.gmra.mrb[8].mxu0 %vm486_vm0, %v468_v33  ;;  %755 = vmatpush1.bf16.msra.mxu1 %v3223_v41  ;;  %v3233_v33 = vld [vmem:[%s4376_s5 + $0x28] ss:$16 sps:$4 sm:$0xff]  }
  0x27   : > { %3090 = vmatprep.mubr.msk.bf16.mxu0 %vm486_vm0, %v469_v34  ;;  %1420 = vmatprep.subr.bf16.mxu1 %v3229_v45 }
  0x28   : > { %1316 = vmatpush1.bf16.msra.mxu0 %v3248_v53 }
  0x29   : > { %1317 = vmatprep.subr.bf16.mxu0 %v3256_v54 }
  0x2c   : > { %1318 = vmatpush1.bf16.msra.mxu0 %v3254_v55  ;;  %v3253_v55 = vld [vmem:[%s4376_s5 + $0x8c] ss:$16 sps:$4 sm:$0xff]  }
  0x2d   : > { %1319 = vmatprep.subr.bf16.mxu0 %v3262_v56 }
  0x2e   : > { %3091 = vmatmul.mubr.msk.bf16.gmra.mrb[12].mxu0 %vm486_vm0, %v470_v37 }
  0x30   : > { %1320 = vmatpush1.bf16.msra.mxu0 %v3260_v57 }
  0x31   : > { %1321 = vmatprep.subr.bf16.mxu0 %v3268_v58 }
  0x34   : > { %1322 = vmatpush1.bf16.msra.mxu0 %v3266_v59  ;;  %v3251_v59 = vld [vmem:[%s4376_s5 + $0x88] ss:$16 sps:$4 sm:$0xff]  }
  0x35   : > { %1323 = vmatprep.subr.bf16.mxu0 %v3274_v60 }
  0x38   : > { %1324 = vmatpush1.bf16.msra.mxu0 %v3272_v61 }
  0x39   : > { %1325 = vmatprep.subr.bf16.mxu0 %v3280_v62  ;;  %v3259_v62 = vld [vmem:[%s4376_s5 + $0xac] ss:$16 sps:$4 sm:$0xff]  }
  0x3c   : > { %1326 = vmatpush1.bf16.msra.mxu0 %v3278_v63 }
  0x3d   : > { %1327 = vmatprep.subr.bf16.mxu0 %v3286_v0 }
  0x40   : > { %1328 = vmatpush1.bf16.msra.mxu0 %v3284_v1 }
  0x41   : > { %1329 = vmatprep.subr.bf16.mxu0 %v3292_v2 }
  0x44   : > { %1330 = vmatpush1.bf16.msra.mxu0 %v3290_v3 }
  0x45   : > { %1331 = vmatprep.subr.bf16.mxu0 %v3298_v4 }
  0x48   : > { %1332 = vmatpush1.bf16.msra.mxu0 %v3296_v5 }
  0x49   : > { %1333 = vmatprep.subr.bf16.mxu0 %v3304_v6  ;;  %v3257_v6 = vld [vmem:[%s4376_s5 + $0xa8] ss:$16 sps:$4 sm:$0xff]  }
  0x4c   : > { %1334 = vmatpush1.bf16.msra.mxu0 %v3302_v7 }
  0xe9   : > { %v3080_v9 = vpop.f32.mrb[0].mxu0 }
  0xea   : > { %v554_v10 = vadd.f32 %v3080_v9, %v3706_v8  ;;  %v545_v11 = vpop.f32.mrb[1].mxu0 }
  0xeb   : > { %v546_v12 = vadd.f32 %v3706_v8, %v545_v11  ;;  %v3081_v13 = vpop.f32.mrb[2].mxu0 }
  0xec   : > { %v557_v14 = vadd.f32 %v3081_v13, %v3706_v8  ;;  %v548_v15 = vpop.f32.mrb[3].mxu0  ;;  %v610_v17 = vmax.f32 %v554_v10, 0.0  ;;  %v3265_v10 = vld [vmem:[%s4376_s5 + $0xcc] ss:$16 sps:$4 sm:$0xff]  }
  0xed   : > { %v549_v16 = vadd.f32 %v3706_v8, %v548_v15  ;;  %v608_v19 = vmax.f32 %v546_v12, 0.0 }
  0xee   : > { %v611_v18 = vmax.f32 %v557_v14, 0.0  ;;  %v3263_v14 = vld [vmem:[%s4376_s5 + $0xc8] ss:$16 sps:$4 sm:$0xff]  }
  0xef   : > { %v609_v20 = vmax.f32 %v549_v16, 0.0  ;;  %v3271_v16 = vld [vmem:[%s4376_s5 + $0xec] ss:$16 sps:$4 sm:$0xff]  }
  0xf0   : > { %v625_v21 = vpack.c.bf16 %v611_v18, %v610_v17  ;;  %v3277_v17 = vld [vmem:[%s4376_s5 + $0x10c] ss:$16 sps:$4 sm:$0xff]   ;;  %v3275_v18 = vld [vmem:[%s4376_s5 + $0x108] ss:$16 sps:$4 sm:$0xff]  }
  0xf1   : > { %v624_v23 = vpack.c.bf16 %v609_v20, %v608_v19  ;;  %v3084_v24 = vpop.f32.mrb[4].mxu0  ;;  %v3283_v19 = vld [vmem:[%s4376_s5 + $0x12c] ss:$16 sps:$4 sm:$0xff]   ;;  %v3281_v20 = vld [vmem:[%s4376_s5 + $0x128] ss:$16 sps:$4 sm:$0xff]  }
  0xf2   : > { %v570_v26 = vadd.f32 %v3084_v24, %v3706_v8  ;;  %v561_v27 = vpop.f32.mrb[5].mxu0  ;;  %v3293_v24 = vld [vmem:[%s4376_s5 + $0x168] ss:$16 sps:$4 sm:$0xff]  }
  0xf3   : > { %773 = vmatmul.mubr.bf16.vlgmr.msra.gmra.mrb[0].mxu1 %v624_v23  ;;  %v562_v28 = vadd.f32 %v3706_v8, %v561_v27  ;;  %v3085_v29 = vpop.f32.mrb[6].mxu0  ;;  %v3295_v23 = vld [vmem:[%s4376_s5 + $0x16c] ss:$16 sps:$4 sm:$0xff]  }
  0xf4   : > { %v614_v30 = vmax.f32 %v570_v26, 0.0  ;;  %v573_v31 = vadd.f32 %v3085_v29, %v3706_v8  ;;  %v564_v32 = vpop.f32.mrb[7].mxu0  ;;  %782 = vmatprep.mubr.bf16.mxu1 %v3448_v42  ;;  %1421 = vmatpush1.bf16.msra.mxu1 %v3227_v22  ;;  %v3287_v22 = vld [vmem:[%s4376_s5 + $0x148] ss:$16 sps:$4 sm:$0xff]   ;;  %v3307_v27 = vld [vmem:[%s4376_s5 + $0x1ac] ss:$16 sps:$4 sm:$0xff]  }
  0xf5   : > { %v612_v34 = vmax.f32 %v562_v28, 0.0  ;;  %v565_v35 = vadd.f32 %v3706_v8, %v564_v32  ;;  %1422 = vmatprep.subr.bf16.mxu1 %v3235_v25  ;;  %v3301_v25 = vld [vmem:[%s4376_s5 + $0x18c] ss:$16 sps:$4 sm:$0xff]   ;;  %v3299_v26 = vld [vmem:[%s4376_s5 + $0x188] ss:$16 sps:$4 sm:$0xff]  }
  0xf6   : > { %v615_v37 = vmax.f32 %v573_v31, 0.0  ;;  %v3305_v28 = vld [vmem:[%s4376_s5 + $0x1a8] ss:$16 sps:$4 sm:$0xff]   ;;  %v3310_v29 = vld [vmem:[%s4376_s5 + $0x1c4] ss:$16 sps:$4 sm:$0xff]  }
  0xf7   : > { %v613_v38 = vmax.f32 %v565_v35, 0.0  ;;  %v3311_v31 = vld [vmem:[%s4376_s5 + $0x1c8] ss:$16 sps:$4 sm:$0xff]   ;;  %1335 = vmatprep.subr.bf16.mxu0 %v3310_v29  ;;  %v3316_v32 = vld [vmem:[%s4376_s5 + $0x1e4] ss:$16 sps:$4 sm:$0xff]  }
  0xf8   : > { %v627_v39 = vpack.c.bf16 %v615_v37, %v614_v30  ;;  %1423 = vmatpush1.bf16.msra.mxu1 %v3233_v33  ;;  %v3313_v30 = vld [vmem:[%s4376_s5 + $0x1cc] ss:$16 sps:$4 sm:$0xff]   ;;  %v3317_v35 = vld [vmem:[%s4376_s5 + $0x1e8] ss:$16 sps:$4 sm:$0xff]   ;;  %v650_v37 = vlaneseq }
  0xf9   : > { %v626_v41 = vpack.c.bf16 %v613_v38, %v612_v34  ;;  %v3088_v43 = vpop.f32.mrb[8].mxu0  ;;  %1424 = vmatprep.subr.bf16.mxu1 %v3241_v36  ;;  %v3319_v33 = vld [vmem:[%s4376_s5 + $0x1ec] ss:$16 sps:$4 sm:$0xff]   ;;  %v3314_v34 = vld [vmem:[%s4376_s5 + $0x1e0] ss:$16 sps:$4 sm:$0xff]  }
  0xfa   : > { %v586_v45 = vadd.f32 %v3088_v43, %v3706_v8  ;;  %v577_v46 = vpop.f32.mrb[9].mxu0  ;;  %v3322_v36 = vld [vmem:[%s4378_s7 + $0x4] ss:$8 sps:$4 sm:$0xff]   ;;  %v3839_v38 = vshrl.u32 %v650_v37, 7 }
  0xfb   : > { %783 = vmatmul.mubr.bf16.gmra.mrb[4].mxu1 %v625_v21  ;;  %v578_v47 = vadd.f32 %v3706_v8, %v577_v46  ;;  %v3089_v48 = vpop.f32.mrb[10].mxu0  ;;  %v3289_v21 = vld [vmem:[%s4376_s5 + $0x14c] ss:$16 sps:$4 sm:$0xff]  }
  0xfc   : > { %792 = vmatprep.mubr.bf16.mxu1 %v3448_v42  ;;  %v618_v49 = vmax.f32 %v586_v45, 0.0  ;;  %v589_v50 = vadd.f32 %v3089_v48, %v3706_v8  ;;  %v580_v51 = vpop.f32.mrb[11].mxu0  ;;  %1425 = vmatpush1.bf16.msra.mxu1 %v3239_v40  ;;  %v648_v40 = vld [vmem:[%s4375_s4] sm:$0x3] }
  0xfd   : > { %v616_v53 = vmax.f32 %v578_v47, 0.0  ;;  %v581_v54 = vadd.f32 %v3706_v8, %v580_v51  ;;  %1426 = vmatprep.subr.bf16.mxu1 %v3247_v44 }
  0xfe   : > { %v619_v56 = vmax.f32 %v589_v50, 0.0 }
  0xff   : > { %v617_v57 = vmax.f32 %v581_v54, 0.0 }
 0x100   : > { %v629_v58 = vpack.c.bf16 %v619_v56, %v618_v49  ;;  %1427 = vmatpush1.bf16.msra.mxu1 %v3245_v52 }
 0x101   : > { %v628_v60 = vpack.c.bf16 %v617_v57, %v616_v53  ;;  %v3092_v61 = vpop.f32.mrb[12].mxu0  ;;  %1428 = vmatprep.subr.bf16.mxu1 %v3253_v55 }
 0x102   : > { %v602_v63 = vadd.f32 %v3092_v61, %v3706_v8  ;;  %v593_v0 = vpop.f32.mrb[13].mxu0 }
 0x103   : > { %793 = vmatmul.mubr.bf16.gmra.mrb[8].mxu1 %v626_v41  ;;  %v594_v1 = vadd.f32 %v3706_v8, %v593_v0  ;;  %v3093_v2 = vpop.f32.mrb[14].mxu0  ;;  %v3848_v41 = vsub.s32 1, %v3839_v38 }
 0x104   : > { %802 = vmatprep.mubr.bf16.mxu1 %v3448_v42  ;;  %v622_v3 = vmax.f32 %v602_v63, 0.0  ;;  %v605_v4 = vadd.f32 %v3093_v2, %v3706_v8  ;;  %v596_v5 = vpop.f32.mrb[15].mxu0  ;;  %1429 = vmatpush1.bf16.msra.mxu1 %v3251_v59  ;;  %v3325_v63 = vld [vmem:[%s4378_s7 + $0x14] ss:$8 sps:$4 sm:$0xff]  }
 0x105   : > { %v620_v7 = vmax.f32 %v594_v1, 0.0  ;;  %v597_v9 = vadd.f32 %v3706_v8, %v596_v5  ;;  %1430 = vmatprep.subr.bf16.mxu1 %v3259_v62  ;;  %v3269_v8 = vld [vmem:[%s4376_s5 + $0xe8] ss:$16 sps:$4 sm:$0xff]   ;;  %v3854_v44 = vrot.slane %v648_v40, %v3848_v41 }
 0x106   : > { %v623_v11 = vmax.f32 %v605_v4, 0.0  ;;  %v3323_v5 = vld [vmem:[%s4378_s7 + $0x10] ss:$8 sps:$4 sm:$0xff]  }
 0x107   : > { %v621_v12 = vmax.f32 %v597_v9, 0.0  ;;  %v3328_v9 = vld [vmem:[%s4378_s7 + $0x24] ss:$8 sps:$4 sm:$0xff]  }
 0x108   : > { %v631_v13 = vpack.c.bf16 %v623_v11, %v622_v3  ;;  %1431 = vmatpush1.bf16.msra.mxu1 %v3257_v6 }
 0x109   : > { %v630_v15 = vpack.c.bf16 %v621_v12, %v620_v7  ;;  %1432 = vmatprep.subr.bf16.mxu1 %v3265_v10 }
 0x10b   : > { %803 = vmatmul.mubr.bf16.gmra.mrb[12].mxu1 %v627_v39  ;;  %v3842_v39 = vsub.s32 0, %v3839_v38 }
 0x10c   : > { %812 = vmatprep.mubr.bf16.mxu1 %v3448_v42  ;;  %1433 = vmatpush1.bf16.msra.mxu1 %v3263_v14 }
 0x10d   : > { %1434 = vmatprep.subr.bf16.mxu1 %v3271_v16  ;;  %v3851_v43 = vrot.slane %v648_v40, %v3842_v39 }
 0x110   : > { %1435 = vmatpush1.bf16.msra.mxu1 %v3269_v8 }
 0x111   : > { %1436 = vmatprep.subr.bf16.mxu1 %v3277_v17  ;;  %v3331_v17 = vld [vmem:[%s4378_s7 + $0x34] ss:$8 sps:$4 sm:$0xff]  }
 0x113   : > { %813 = vmatmul.mubr.bf16.gmra.mrb[16].mxu1 %v628_v60  ;;  %v3320_v60 = vld [vmem:[%s4378_s7] ss:$8 sps:$4 sm:$0xff]  }
 0x114   : > { %822 = vmatprep.mubr.bf16.mxu1 %v3448_v42  ;;  %1437 = vmatpush1.bf16.msra.mxu1 %v3275_v18 }
 0x115   : > { %1438 = vmatprep.subr.bf16.mxu1 %v3283_v19 }
 0x118   : > { %1439 = vmatpush1.bf16.msra.mxu1 %v3281_v20 }
 0x119   : > { %1440 = vmatprep.subr.bf16.mxu1 %v3289_v21 }
 0x11b   : > { %823 = vmatmul.mubr.bf16.gmra.mrb[20].mxu1 %v629_v58 }
 0x11c   : > { %832 = vmatprep.mubr.bf16.mxu1 %v3448_v42  ;;  %1441 = vmatpush1.bf16.msra.mxu1 %v3287_v22 }
 0x11d   : > { %1442 = vmatprep.subr.bf16.mxu1 %v3295_v23  ;;  %v3329_v23 = vld [vmem:[%s4378_s7 + $0x30] ss:$8 sps:$4 sm:$0xff]  }
 0x120   : > { %1443 = vmatpush1.bf16.msra.mxu1 %v3293_v24 }
 0x121   : > { %1444 = vmatprep.subr.bf16.mxu1 %v3301_v25 }
 0x123   : > { %833 = vmatmul.mubr.bf16.gmra.mrb[24].mxu1 %v630_v15  ;;  %v3326_v15 = vld [vmem:[%s4378_s7 + $0x20] ss:$8 sps:$4 sm:$0xff]  }
 0x124   : > { %842 = vmatprep.mubr.bf16.mxu1 %v3448_v42  ;;  %1445 = vmatpush1.bf16.msra.mxu1 %v3299_v26  ;;  %v3308_v42 = vld [vmem:[%s4376_s5 + $0x1c0] ss:$16 sps:$4 sm:$0xff]   ;;  %v3334_v26 = vld [vmem:[%s4378_s7 + $0x44] ss:$8 sps:$4 sm:$0xff]  }
 0x125   : > { %1446 = vmatprep.subr.bf16.mxu1 %v3307_v27  ;;  %1336 = vmatpush1.bf16.msra.mxu0 %v3308_v42 }
 0x126   : > { %1337 = vmatprep.subr.bf16.mxu0 %v3316_v32 }
 0x128   : > { %1447 = vmatpush1.bf16.msra.mxu1 %v3305_v28 }
 0x129   : > { %1448 = vmatprep.subr.bf16.mxu1 %v3313_v30  ;;  %1338 = vmatpush1.bf16.msra.mxu0 %v3314_v34  ;;  %v3337_v34 = vld [vmem:[%s4378_s7 + $0x54] ss:$8 sps:$4 sm:$0xff]  }
 0x12a   : > { %2025 = vmatprep.subr.bf16.mxu0 %v3322_v36 }
 0x12b   : > { %843 = vmatmul.mubr.bf16.gmra.mrb[28].mxu1 %v631_v13 }
 0x12c   : > { %1449 = vmatpush1.bf16.msra.mxu1 %v3311_v31  ;;  %v3332_v31 = vld [vmem:[%s4378_s7 + $0x40] ss:$8 sps:$4 sm:$0xff]  }
 0x12d   : > { %1450 = vmatprep.subr.bf16.mxu1 %v3319_v33 }
 0x130   : > { %1451 = vmatpush1.bf16.msra.mxu1 %v3317_v35 }
 0x1c6   : > { %v774_v45 = vpop.f32.mrb[0].mxu1 }
 0x1c7   : > { %v775_v46 = vadd.f32 %v774_v45, %v3851_v43  ;;  %v776_v47 = vpop.f32.mrb[1].mxu1 }
 0x1c8   : > { %v777_v48 = vadd.f32 %v776_v47, %v3854_v44  ;;  %v778_v49 = vpop.f32.mrb[2].mxu1 }
 0x1c9   : > { %v779_v50 = vadd.f32 %v778_v49, %v3851_v43  ;;  %v780_v51 = vpop.f32.mrb[3].mxu1  ;;  %v853_v53 = vmax.f32 %v775_v46, 0.0  ;;  %v3335_v46 = vld [vmem:[%s4378_s7 + $0x50] ss:$8 sps:$4 sm:$0xff]   ;;  %v3340_v49 = vld [vmem:[%s4378_s7 + $0x64] ss:$8 sps:$4 sm:$0xff]  }
 0x1ca   : > { %v781_v52 = vadd.f32 %v780_v51, %v3854_v44  ;;  %v854_v55 = vmax.f32 %v777_v48, 0.0 }
 0x1cb   : > { %v855_v54 = vmax.f32 %v779_v50, 0.0 }
 0x1cc   : > { %v856_v56 = vmax.f32 %v781_v52, 0.0 }
 0x1cd   : > { %v885_v57 = vpack.c.bf16 %v855_v54, %v853_v53 }
 0x1ce   : > { %v886_v58 = vpack.c.bf16 %v856_v56, %v854_v55  ;;  %v784_v59 = vpop.f32.mrb[4].mxu1  ;;  %v3338_v55 = vld [vmem:[%s4378_s7 + $0x60] ss:$8 sps:$4 sm:$0xff]  }
 0x1cf   : > { %v785_v61 = vadd.f32 %v784_v59, %v3851_v43  ;;  %v786_v62 = vpop.f32.mrb[5].mxu1 }
 0x1d0   : > { %v787_v0 = vadd.f32 %v786_v62, %v3854_v44  ;;  %v788_v1 = vpop.f32.mrb[6].mxu1  ;;  %1339 = vmatprep.mubr.bf16.mxu0 %v886_v58  ;;  %1452 = vmatprep.mubr.bf16.mxu1 %v886_v58  ;;  %v3343_v58 = vld [vmem:[%s4378_s7 + $0x74] ss:$8 sps:$4 sm:$0xff]  }
 0x1d1   : > { %v789_v2 = vadd.f32 %v788_v1, %v3851_v43  ;;  %v790_v3 = vpop.f32.mrb[7].mxu1  ;;  %1340 = vmatmul.mubr.bf16.vlgmr.msra.gmra.mrb[16].mxu0 %v885_v57  ;;  %1453 = vmatmul.mubr.bf16.vlgmr.msra.gmra.mrb[32].mxu1 %v885_v57  ;;  %v857_v6 = vmax.f32 %v785_v61, 0.0 }
 0x1d2   : > { %v791_v4 = vadd.f32 %v790_v3, %v3854_v44  ;;  %2026 = vmatpush1.bf16.msra.mxu0 %v3320_v60  ;;  %v858_v10 = vmax.f32 %v787_v0, 0.0  ;;  %v3341_v0 = vld [vmem:[%s4378_s7 + $0x70] ss:$8 sps:$4 sm:$0xff]   ;;  %v3346_v3 = vld [vmem:[%s4378_s7 + $0x84] ss:$8 sps:$4 sm:$0xff]  }
 0x1d3   : > { %v859_v7 = vmax.f32 %v789_v2, 0.0  ;;  %2027 = vmatprep.subr.bf16.mxu0 %v3325_v63 }
 0x1d4   : > { %v860_v11 = vmax.f32 %v791_v4, 0.0 }
 0x1d5   : > { %v887_v12 = vpack.c.bf16 %v859_v7, %v857_v6 }
 0x1d6   : > { %v888_v13 = vpack.c.bf16 %v860_v11, %v858_v10  ;;  %v794_v14 = vpop.f32.mrb[8].mxu1  ;;  %2028 = vmatpush1.bf16.msra.mxu0 %v3323_v5  ;;  %v3344_v10 = vld [vmem:[%s4378_s7 + $0x80] ss:$8 sps:$4 sm:$0xff]  }
 0x1d7   : > { %v795_v16 = vadd.f32 %v794_v14, %v3851_v43  ;;  %v796_v8 = vpop.f32.mrb[9].mxu1  ;;  %2029 = vmatprep.subr.bf16.mxu0 %v3328_v9 }
 0x1d8   : > { %v797_v18 = vadd.f32 %v796_v8, %v3854_v44  ;;  %v798_v19 = vpop.f32.mrb[10].mxu1  ;;  %1349 = vmatprep.mubr.bf16.mxu0 %v888_v13  ;;  %1462 = vmatprep.mubr.bf16.mxu1 %v888_v13  ;;  %v3349_v13 = vld [vmem:[%s4378_s7 + $0x94] ss:$8 sps:$4 sm:$0xff]  }
 0x1d9   : > { %v799_v20 = vadd.f32 %v798_v19, %v3851_v43  ;;  %v800_v21 = vpop.f32.mrb[11].mxu1  ;;  %1350 = vmatmul.mubr.bf16.gmra.mrb[20].mxu0 %v887_v12  ;;  %1463 = vmatmul.mubr.bf16.gmra.mrb[36].mxu1 %v887_v12  ;;  %v861_v24 = vmax.f32 %v795_v16, 0.0 }
 0x1da   : > { %v801_v22 = vadd.f32 %v800_v21, %v3854_v44  ;;  %2030 = vmatpush1.bf16.msra.mxu0 %v3326_v15  ;;  %v862_v27 = vmax.f32 %v797_v18, 0.0  ;;  %v3347_v18 = vld [vmem:[%s4378_s7 + $0x90] ss:$8 sps:$4 sm:$0xff]   ;;  %v3352_v21 = vld [vmem:[%s4378_s7 + $0xa4] ss:$8 sps:$4 sm:$0xff]  }
 0x1db   : > { %v863_v25 = vmax.f32 %v799_v20, 0.0  ;;  %2031 = vmatprep.subr.bf16.mxu0 %v3331_v17 }
 0x1dc   : > { %v864_v28 = vmax.f32 %v801_v22, 0.0 }
 0x1dd   : > { %v889_v29 = vpack.c.bf16 %v863_v25, %v861_v24 }
 0x1de   : > { %v890_v30 = vpack.c.bf16 %v864_v28, %v862_v27  ;;  %v804_v42 = vpop.f32.mrb[12].mxu1  ;;  %2032 = vmatpush1.bf16.msra.mxu0 %v3329_v23  ;;  %v3350_v27 = vld [vmem:[%s4378_s7 + $0xa0] ss:$8 sps:$4 sm:$0xff]  }
 0x1df   : > { %v805_v32 = vadd.f32 %v804_v42, %v3851_v43  ;;  %v806_v33 = vpop.f32.mrb[13].mxu1  ;;  %2033 = vmatprep.subr.bf16.mxu0 %v3334_v26 }
 0x1e0   : > { %v807_v35 = vadd.f32 %v806_v33, %v3854_v44  ;;  %v808_v36 = vpop.f32.mrb[14].mxu1  ;;  %1359 = vmatprep.mubr.bf16.mxu0 %v890_v30  ;;  %1472 = vmatprep.mubr.bf16.mxu1 %v890_v30  ;;  %v3355_v30 = vld [vmem:[%s4378_s7 + $0xb4] ss:$8 sps:$4 sm:$0xff]  }
 0x1e1   : > { %v809_v37 = vadd.f32 %v808_v36, %v3851_v43  ;;  %v810_v40 = vpop.f32.mrb[15].mxu1  ;;  %1360 = vmatmul.mubr.bf16.gmra.mrb[24].mxu0 %v889_v29  ;;  %1473 = vmatmul.mubr.bf16.gmra.mrb[40].mxu1 %v889_v29  ;;  %v865_v47 = vmax.f32 %v805_v32, 0.0 }
 0x1e2   : > { %v811_v45 = vadd.f32 %v810_v40, %v3854_v44  ;;  %2034 = vmatpush1.bf16.msra.mxu0 %v3332_v31  ;;  %v866_v50 = vmax.f32 %v807_v35, 0.0  ;;  %v3353_v35 = vld [vmem:[%s4378_s7 + $0xb0] ss:$8 sps:$4 sm:$0xff]   ;;  %v3358_v40 = vld [vmem:[%s4378_s7 + $0xc4] ss:$8 sps:$4 sm:$0xff]  }
 0x1e3   : > { %v867_v48 = vmax.f32 %v809_v37, 0.0  ;;  %2035 = vmatprep.subr.bf16.mxu0 %v3337_v34 }
 0x1e4   : > { %v868_v51 = vmax.f32 %v811_v45, 0.0 }
 0x1e5   : > { %v891_v52 = vpack.c.bf16 %v867_v48, %v865_v47 }
 0x1e6   : > { %v892_v53 = vpack.c.bf16 %v868_v51, %v866_v50  ;;  %v814_v54 = vpop.f32.mrb[16].mxu1  ;;  %2036 = vmatpush1.bf16.msra.mxu0 %v3335_v46  ;;  %v3356_v50 = vld [vmem:[%s4378_s7 + $0xc0] ss:$8 sps:$4 sm:$0xff]  }
 0x1e7   : > { %v815_v56 = vadd.f32 %v814_v54, %v3851_v43  ;;  %v816_v57 = vpop.f32.mrb[17].mxu1  ;;  %2037 = vmatprep.subr.bf16.mxu0 %v3340_v49 }
 0x1e8   : > { %v817_v59 = vadd.f32 %v816_v57, %v3854_v44  ;;  %v818_v60 = vpop.f32.mrb[18].mxu1  ;;  %1369 = vmatprep.mubr.bf16.mxu0 %v892_v53  ;;  %1482 = vmatprep.mubr.bf16.mxu1 %v892_v53  ;;  %v3361_v53 = vld [vmem:[%s4378_s7 + $0xd4] ss:$8 sps:$4 sm:$0xff]  }
 0x1e9   : > { %v819_v61 = vadd.f32 %v818_v60, %v3851_v43  ;;  %v820_v62 = vpop.f32.mrb[19].mxu1  ;;  %1370 = vmatmul.mubr.bf16.gmra.mrb[28].mxu0 %v891_v52  ;;  %1483 = vmatmul.mubr.bf16.gmra.mrb[44].mxu1 %v891_v52  ;;  %v869_v1 = vmax.f32 %v815_v56, 0.0 }
 0x1ea   : > { %v821_v63 = vadd.f32 %v820_v62, %v3854_v44  ;;  %2038 = vmatpush1.bf16.msra.mxu0 %v3338_v55  ;;  %v870_v4 = vmax.f32 %v817_v59, 0.0  ;;  %v3359_v59 = vld [vmem:[%s4378_s7 + $0xd0] ss:$8 sps:$4 sm:$0xff]  }
 0x1eb   : > { %v871_v2 = vmax.f32 %v819_v61, 0.0  ;;  %2039 = vmatprep.subr.bf16.mxu0 %v3343_v58 }
 0x1ec   : > { %v872_v5 = vmax.f32 %v821_v63, 0.0 }
 0x1ed   : > { %v893_v6 = vpack.c.bf16 %v871_v2, %v869_v1  ;;  %v3367_v2 = vld [vmem:[%s4378_s7 + $0xf4] ss:$8 sps:$4 sm:$0xff]  }
 0x1ee   : > { %v894_v7 = vpack.c.bf16 %v872_v5, %v870_v4  ;;  %v824_v9 = vpop.f32.mrb[20].mxu1  ;;  %2040 = vmatpush1.bf16.msra.mxu0 %v3341_v0  ;;  %v3370_v4 = vld [vmem:[%s4378_s7 + $0x104] ss:$8 sps:$4 sm:$0xff]   ;;  %v977_v5 = vsub.s32 2, %v3839_v38 }
 0x1ef   : > { %v825_v11 = vadd.f32 %v824_v9, %v3851_v43  ;;  %v826_v12 = vpop.f32.mrb[21].mxu1  ;;  %2041 = vmatprep.subr.bf16.mxu0 %v3346_v3  ;;  %v3365_v3 = vld [vmem:[%s4378_s7 + $0xf0] ss:$8 sps:$4 sm:$0xff]  }
 0x1f0   : > { %v827_v14 = vadd.f32 %v826_v12, %v3854_v44  ;;  %v828_v15 = vpop.f32.mrb[22].mxu1  ;;  %1379 = vmatprep.mubr.bf16.mxu0 %v894_v7  ;;  %1492 = vmatprep.mubr.bf16.mxu1 %v894_v7  ;;  %v981_v7 = vsub.s32 3, %v3839_v38 }
 0x1f1   : > { %v829_v16 = vadd.f32 %v828_v15, %v3851_v43  ;;  %v830_v8 = vpop.f32.mrb[23].mxu1  ;;  %1380 = vmatmul.mubr.bf16.gmra.mrb[32].mxu0 %v893_v6  ;;  %1493 = vmatmul.mubr.bf16.gmra.mrb[48].mxu1 %v893_v6  ;;  %v873_v19 = vmax.f32 %v825_v11, 0.0  ;;  %v965_v6 = vld [vmem:[%s4377_s6] sm:$0xf] }
 0x1f2   : > { %v831_v17 = vadd.f32 %v830_v8, %v3854_v44  ;;  %2042 = vmatpush1.bf16.msra.mxu0 %v3344_v10  ;;  %v874_v22 = vmax.f32 %v827_v14, 0.0  ;;  %v3990_v9 = vrot.slane %v965_v6, %v3842_v39  ;;  %v3992_v10 = vrot.slane %v965_v6, %v977_v5 }
 0x1f3   : > { %v875_v20 = vmax.f32 %v829_v16, 0.0  ;;  %2043 = vmatprep.subr.bf16.mxu0 %v3349_v13  ;;  %v3995_v11 = vrot.slane %v965_v6, %v3848_v41  ;;  %v3997_v12 = vrot.slane %v965_v6, %v981_v7 }
 0x1f4   : > { %v876_v23 = vmax.f32 %v831_v17, 0.0 }
 0x1f5   : > { %v895_v24 = vpack.c.bf16 %v875_v20, %v873_v19 }
 0x1f6   : > { %v896_v25 = vpack.c.bf16 %v876_v23, %v874_v22  ;;  %v834_v26 = vpop.f32.mrb[24].mxu1  ;;  %2044 = vmatpush1.bf16.msra.mxu0 %v3347_v18 }
 0x1f7   : > { %v835_v28 = vadd.f32 %v834_v26, %v3851_v43  ;;  %v836_v29 = vpop.f32.mrb[25].mxu1  ;;  %2045 = vmatprep.subr.bf16.mxu0 %v3352_v21  ;;  %v3417_v26 = vld [vmem:[%s4380_s9] sm:$0xff]  }
 0x1f8   : > { %v837_v42 = vadd.f32 %v836_v29, %v3854_v44  ;;  %v838_v31 = vpop.f32.mrb[26].mxu1  ;;  %1389 = vmatprep.mubr.bf16.mxu0 %v896_v25  ;;  %1502 = vmatprep.mubr.bf16.mxu1 %v896_v25  ;;  %v3416_v25 = vld [vmem:[%s4380_s9 + $0x40] sm:$0xff]   ;;  %v3418_v29 = vld [vmem:[%s4380_s9 + $0x48] sm:$0xff]  }
 0x1f9   : > { %v839_v32 = vadd.f32 %v838_v31, %v3851_v43  ;;  %v840_v33 = vpop.f32.mrb[27].mxu1  ;;  %1390 = vmatmul.mubr.bf16.gmra.mrb[36].mxu0 %v895_v24  ;;  %1503 = vmatmul.mubr.bf16.gmra.mrb[52].mxu1 %v895_v24  ;;  %v877_v36 = vmax.f32 %v835_v28, 0.0 }
 0x1fa   : > { %v841_v34 = vadd.f32 %v840_v33, %v3854_v44  ;;  %2046 = vmatpush1.bf16.msra.mxu0 %v3350_v27  ;;  %v878_v45 = vmax.f32 %v837_v42, 0.0  ;;  %2996 = vmatprep.subr.bf16.mxu1 %v3416_v25 }
 0x1fb   : > { %v879_v37 = vmax.f32 %v839_v32, 0.0  ;;  %2047 = vmatprep.subr.bf16.mxu0 %v3355_v30  ;;  %2997 = vmatpush3.bf16.msra.mxu1 %v3417_v26 }
 0x1fc   : > { %v880_v46 = vmax.f32 %v841_v34, 0.0  ;;  %2998 = vmatprep.subr.bf16.mxu1 %v3418_v29  ;;  %v3379_v29 = vld [vmem:[%s4378_s7 + $0x134] ss:$8 sps:$4 sm:$0xff]  }
 0x1fd   : > { %v897_v47 = vpack.c.bf16 %v879_v37, %v877_v36  ;;  %v3419_v37 = vld [vmem:[%s4380_s9 + $0x8] sm:$0xff]  }
 0x1fe   : > { %v898_v48 = vpack.c.bf16 %v880_v46, %v878_v45  ;;  %v844_v49 = vpop.f32.mrb[28].mxu1  ;;  %2048 = vmatpush1.bf16.msra.mxu0 %v3353_v35  ;;  %v3420_v46 = vld [vmem:[%s4380_s9 + $0x50] sm:$0xff]  }
 0x1ff   : > { %v845_v51 = vadd.f32 %v844_v49, %v3851_v43  ;;  %v846_v52 = vpop.f32.mrb[29].mxu1  ;;  %2049 = vmatprep.subr.bf16.mxu0 %v3358_v40  ;;  %2999 = vmatpush3.bf16.msra.mxu1 %v3419_v37 }
 0x200   : > { %v847_v54 = vadd.f32 %v846_v52, %v3854_v44  ;;  %v848_v55 = vpop.f32.mrb[30].mxu1  ;;  %1399 = vmatprep.mubr.bf16.mxu0 %v898_v48  ;;  %1512 = vmatprep.mubr.bf16.mxu1 %v898_v48 }
 0x201   : > { %v849_v56 = vadd.f32 %v848_v55, %v3851_v43  ;;  %v850_v57 = vpop.f32.mrb[31].mxu1  ;;  %1400 = vmatmul.mubr.bf16.gmra.mrb[40].mxu0 %v897_v47  ;;  %1513 = vmatmul.mubr.bf16.gmra.mrb[56].mxu1 %v897_v47  ;;  %v881_v60 = vmax.f32 %v845_v51, 0.0  ;;  %v3364_v43 = vld [vmem:[%s4378_s7 + $0xe4] ss:$8 sps:$4 sm:$0xff]   ;;  %v3368_v51 = vld [vmem:[%s4378_s7 + $0x100] ss:$8 sps:$4 sm:$0xff]  }
 0x202   : > { %v851_v58 = vadd.f32 %v850_v57, %v3854_v44  ;;  %2050 = vmatpush1.bf16.msra.mxu0 %v3356_v50  ;;  %v882_v62 = vmax.f32 %v847_v54, 0.0  ;;  %v3362_v44 = vld [vmem:[%s4378_s7 + $0xe0] ss:$8 sps:$4 sm:$0xff]   ;;  %3000 = vmatprep.subr.bf16.mxu1 %v3420_v46 }
 0x203   : > { %v883_v61 = vmax.f32 %v849_v56, 0.0  ;;  %2051 = vmatprep.subr.bf16.mxu0 %v3361_v53  ;;  %v3373_v56 = vld [vmem:[%s4378_s7 + $0x114] ss:$8 sps:$4 sm:$0xff]  }
 0x204   : > { %v884_v63 = vmax.f32 %v851_v58, 0.0 }
 0x205   : > { %v899_v0 = vpack.c.bf16 %v883_v61, %v881_v60  ;;  %v3421_v61 = vld [vmem:[%s4380_s9 + $0x10] sm:$0xff]  }
 0x206   : > { %v900_v1 = vpack.c.bf16 %v884_v63, %v882_v62  ;;  %2052 = vmatpush1.bf16.msra.mxu0 %v3359_v59  ;;  %3001 = vmatpush3.bf16.msra.mxu1 %v3421_v61 }
 0x207   : > { %2053 = vmatprep.subr.bf16.mxu0 %v3364_v43  ;;  %v3422_v43 = vld [vmem:[%s4380_s9 + $0x58] sm:$0xff]  }
 0x208   : > { %1409 = vmatprep.mubr.bf16.mxu0 %v900_v1  ;;  %1522 = vmatprep.mubr.bf16.mxu1 %v900_v1 }
 0x209   : > { %1410 = vmatmul.mubr.bf16.gmra.mrb[44].mxu0 %v899_v0  ;;  %1523 = vmatmul.mubr.bf16.gmra.mrb[60].mxu1 %v899_v0 }
 0x20a   : > { %2054 = vmatpush1.bf16.msra.mxu0 %v3362_v44  ;;  %3002 = vmatprep.subr.bf16.mxu1 %v3422_v43 }
 0x20b   : > { %2055 = vmatprep.subr.bf16.mxu0 %v3367_v2 }
 0x20e   : > { %2056 = vmatpush1.bf16.msra.mxu0 %v3365_v3  ;;  %v3371_v3 = vld [vmem:[%s4378_s7 + $0x110] ss:$8 sps:$4 sm:$0xff]  }
 0x20f   : > { %2138 = vmatprep.subr.bf16.mxu0 %v3370_v4 }
 0x2a4   : > { %v1341_v13 = vpop.f32.mrb[16].mxu0  ;;  %v1454_v14 = vpop.f32.mrb[32].mxu1 }
 0x2a5   : > { %v1342_v15 = vadd.f32 %v1341_v13, %v3990_v9  ;;  %v1455_v16 = vadd.f32 %v1454_v14, %v3992_v10  ;;  %v1343_v8 = vpop.f32.mrb[17].mxu0  ;;  %v1456_v17 = vpop.f32.mrb[33].mxu1  ;;  %v3376_v13 = vld [vmem:[%s4378_s7 + $0x124] ss:$8 sps:$4 sm:$0xff]  }
 0x2a6   : > { %v1344_v38 = vadd.f32 %v1343_v8, %v3995_v11  ;;  %v1457_v18 = vadd.f32 %v1456_v17, %v3997_v12  ;;  %v1345_v19 = vpop.f32.mrb[18].mxu0  ;;  %v1458_v20 = vpop.f32.mrb[34].mxu1  ;;  %v3423_v17 = vld [vmem:[%s4380_s9 + $0x18] sm:$0xff]  }
 0x2a7   : > { %v1346_v21 = vadd.f32 %v1345_v19, %v3990_v9  ;;  %v1459_v22 = vadd.f32 %v1458_v20, %v3992_v10  ;;  %v1347_v23 = vpop.f32.mrb[19].mxu0  ;;  %v1460_v24 = vpop.f32.mrb[35].mxu1  ;;  %v1533_v30 = vmax.f32 %v1342_v15, 0.0  ;;  %v1535_v42 = vmax.f32 %v1455_v16, 0.0  ;;  %v3424_v19 = vld [vmem:[%s4380_s9 + $0x60] sm:$0xff]   ;;  %3003 = vmatpush3.bf16.msra.mxu1 %v3423_v17 }
 0x2a8   : > { %v1348_v27 = vadd.f32 %v1347_v23, %v3995_v11  ;;  %v1461_v28 = vadd.f32 %v1460_v24, %v3997_v12  ;;  %v1534_v33 = vmax.f32 %v1344_v38, 0.0  ;;  %v1536_v34 = vmax.f32 %v1457_v18, 0.0  ;;  %v3374_v24 = vld [vmem:[%s4378_s7 + $0x120] ss:$8 sps:$4 sm:$0xff]   ;;  %3004 = vmatprep.subr.bf16.mxu1 %v3424_v19 }
 0x2a9   : > { %v1537_v31 = vmax.f32 %v1346_v21, 0.0  ;;  %v1539_v32 = vmax.f32 %v1459_v22, 0.0 }
 0x2aa   : > { %v1538_v35 = vmax.f32 %v1348_v27, 0.0  ;;  %v1540_v36 = vmax.f32 %v1461_v28, 0.0 }
 0x2ab   : > { %v1597_v40 = vpack.c.bf16 %v1537_v31, %v1533_v30  ;;  %v4019_v45 = vpack.c.bf16 %v1539_v32, %v1535_v42 }
 0x2ac   : > { %v1598_v47 = vpack.c.bf16 %v1538_v35, %v1534_v33  ;;  %v4024_v48 = vpack.c.bf16 %v1540_v36, %v1536_v34  ;;  %v1351_v49 = vpop.f32.mrb[20].mxu0  ;;  %v1464_v50 = vpop.f32.mrb[36].mxu1  ;;  %v3425_v33 = vld [vmem:[%s4380_s9 + $0x20] sm:$0xff]  }
 0x2ad   : > { %v1352_v52 = vadd.f32 %v1351_v49, %v3990_v9  ;;  %v1465_v53 = vadd.f32 %v1464_v50, %v3992_v10  ;;  %v1353_v54 = vpop.f32.mrb[21].mxu0  ;;  %v1466_v55 = vpop.f32.mrb[37].mxu1  ;;  %v3377_v49 = vld [vmem:[%s4378_s7 + $0x130] ss:$8 sps:$4 sm:$0xff]   ;;  %3005 = vmatpush3.bf16.msra.mxu1 %v3425_v33 }
 0x2ae   : > { %v1354_v57 = vadd.f32 %v1353_v54, %v3995_v11  ;;  %v1467_v58 = vadd.f32 %v1466_v55, %v3997_v12  ;;  %v1355_v59 = vpop.f32.mrb[22].mxu0  ;;  %v1468_v60 = vpop.f32.mrb[38].mxu1  ;;  %2057 = vmatprep.mubr.bf16.mxu0 %v1598_v47  ;;  %v3382_v54 = vld [vmem:[%s4378_s7 + $0x144] ss:$8 sps:$4 sm:$0xff]  }
 0x2af   : > { %v1356_v62 = vadd.f32 %v1355_v59, %v3990_v9  ;;  %v1469_v63 = vadd.f32 %v1468_v60, %v3992_v10  ;;  %v1357_v0 = vpop.f32.mrb[23].mxu0  ;;  %v1470_v1 = vpop.f32.mrb[39].mxu1  ;;  %2058 = vmatmul.mubr.bf16.vlgmr.msra.gmra.mrb[48].mxu0 %v1597_v40  ;;  %v1541_v4 = vmax.f32 %v1352_v52, 0.0  ;;  %v1543_v5 = vmax.f32 %v1465_v53, 0.0  ;;  %v3426_v40 = vld [vmem:[%s4380_s9 + $0x68] sm:$0xff]  }
 0x2b0   : > { %v1358_v44 = vadd.f32 %v1357_v0, %v3995_v11  ;;  %v1471_v2 = vadd.f32 %v1470_v1, %v3997_v12  ;;  %2139 = vmatpush1.bf16.msra.mxu0 %v3368_v51  ;;  %v1542_v14 = vmax.f32 %v1354_v57, 0.0  ;;  %v1544_v15 = vmax.f32 %v1467_v58, 0.0  ;;  %v3427_v59 = vld [vmem:[%s4380_s9 + $0x28] sm:$0xff]   ;;  %3006 = vmatprep.subr.bf16.mxu1 %v3426_v40 }
 0x2b1   : > { %v1545_v6 = vmax.f32 %v1356_v62, 0.0  ;;  %v1547_v7 = vmax.f32 %v1469_v63, 0.0  ;;  %2140 = vmatprep.subr.bf16.mxu0 %v3373_v56  ;;  %v3428_v62 = vld [vmem:[%s4380_s9 + $0x70] sm:$0xff]   ;;  %3007 = vmatpush3.bf16.msra.mxu1 %v3427_v59  ;;  %v3386_v40 = vld [vmem:[%s4378_s7 + $0x160] ss:$8 sps:$4 sm:$0xff]  }
 0x2b2   : > { %v1546_v16 = vmax.f32 %v1358_v44, 0.0  ;;  %v1548_v8 = vmax.f32 %v1471_v2, 0.0  ;;  %v3380_v44 = vld [vmem:[%s4378_s7 + $0x140] ss:$8 sps:$4 sm:$0xff]   ;;  %3008 = vmatprep.subr.bf16.mxu1 %v3428_v62 }
 0x2b3   : > { %v1601_v38 = vpack.c.bf16 %v1545_v6, %v1541_v4  ;;  %v4055_v18 = vpack.c.bf16 %v1547_v7, %v1543_v5  ;;  %v3385_v6 = vld [vmem:[%s4378_s7 + $0x154] ss:$8 sps:$4 sm:$0xff]  }
 0x2b4   : > { %v1602_v20 = vpack.c.bf16 %v1546_v16, %v1542_v14  ;;  %v4060_v21 = vpack.c.bf16 %v1548_v8, %v1544_v15  ;;  %2141 = vmatpush1.bf16.msra.mxu0 %v3371_v3  ;;  %v1361_v22 = vpop.f32.mrb[24].mxu0  ;;  %v1474_v23 = vpop.f32.mrb[40].mxu1  ;;  %v3429_v16 = vld [vmem:[%s4380_s9 + $0x30] sm:$0xff]  }
 0x2b5   : > { %v1362_v25 = vadd.f32 %v1361_v22, %v3990_v9  ;;  %v1475_v26 = vadd.f32 %v1474_v23, %v3992_v10  ;;  %v1363_v27 = vpop.f32.mrb[25].mxu0  ;;  %v1476_v28 = vpop.f32.mrb[41].mxu1  ;;  %2142 = vmatprep.subr.bf16.mxu0 %v3376_v13  ;;  %v3383_v23 = vld [vmem:[%s4378_s7 + $0x150] ss:$8 sps:$4 sm:$0xff]   ;;  %3009 = vmatpush3.bf16.msra.mxu1 %v3429_v16 }
 0x2b6   : > { %v1364_v30 = vadd.f32 %v1363_v27, %v3995_v11  ;;  %v1477_v42 = vadd.f32 %v1476_v28, %v3997_v12  ;;  %v1365_v31 = vpop.f32.mrb[26].mxu0  ;;  %v1478_v32 = vpop.f32.mrb[42].mxu1  ;;  %2067 = vmatprep.mubr.bf16.mxu0 %v1602_v20  ;;  %v3388_v28 = vld [vmem:[%s4378_s7 + $0x164] ss:$8 sps:$4 sm:$0xff]  }
 0x2b7   : > { %v1366_v34 = vadd.f32 %v1365_v31, %v3990_v9  ;;  %v1479_v35 = vadd.f32 %v1478_v32, %v3992_v10  ;;  %v1367_v36 = vpop.f32.mrb[27].mxu0  ;;  %v1480_v37 = vpop.f32.mrb[43].mxu1  ;;  %2068 = vmatmul.mubr.bf16.gmra.mrb[52].mxu0 %v1601_v38  ;;  %v1549_v50 = vmax.f32 %v1362_v25, 0.0  ;;  %v1551_v51 = vmax.f32 %v1475_v26, 0.0 }
 0x2b8   : > { %v1368_v46 = vadd.f32 %v1367_v36, %v3995_v11  ;;  %v1481_v47 = vadd.f32 %v1480_v37, %v3997_v12  ;;  %2143 = vmatpush1.bf16.msra.mxu0 %v3374_v24  ;;  %v1550_v55 = vmax.f32 %v1364_v30, 0.0  ;;  %v1552_v56 = vmax.f32 %v1477_v42, 0.0 }
 0x2b9   : > { %v1553_v52 = vmax.f32 %v1366_v34, 0.0  ;;  %v1555_v53 = vmax.f32 %v1479_v35, 0.0  ;;  %2144 = vmatprep.subr.bf16.mxu0 %v3379_v29 }
 0x2ba   : > { %v1554_v57 = vmax.f32 %v1368_v46, 0.0  ;;  %v1556_v58 = vmax.f32 %v1481_v47, 0.0 }
 0x2bb   : > { %v1605_v60 = vpack.c.bf16 %v1553_v52, %v1549_v50  ;;  %v4091_v61 = vpack.c.bf16 %v1555_v53, %v1551_v51  ;;  %v3391_v51 = vld [vmem:[%s4378_s7 + $0x174] ss:$8 sps:$4 sm:$0xff]  }
 0x2bc   : > { %v1606_v63 = vpack.c.bf16 %v1554_v57, %v1550_v55  ;;  %v4096_v0 = vpack.c.bf16 %v1556_v58, %v1552_v56  ;;  %2145 = vmatpush1.bf16.msra.mxu0 %v3377_v49  ;;  %v1371_v1 = vpop.f32.mrb[28].mxu0  ;;  %v1484_v43 = vpop.f32.mrb[44].mxu1 }
 0x2bd   : > { %v1372_v2 = vadd.f32 %v1371_v1, %v3990_v9  ;;  %v1485_v3 = vadd.f32 %v1484_v43, %v3992_v10  ;;  %v1373_v4 = vpop.f32.mrb[29].mxu0  ;;  %v1486_v5 = vpop.f32.mrb[45].mxu1  ;;  %2146 = vmatprep.subr.bf16.mxu0 %v3382_v54 }
 0x2be   : > { %v1374_v7 = vadd.f32 %v1373_v4, %v3995_v11  ;;  %v1487_v13 = vadd.f32 %v1486_v5, %v3997_v12  ;;  %v1375_v14 = vpop.f32.mrb[30].mxu0  ;;  %v1488_v15 = vpop.f32.mrb[46].mxu1  ;;  %2077 = vmatprep.mubr.bf16.mxu0 %v1606_v63  ;;  %v3389_v63 = vld [vmem:[%s4378_s7 + $0x170] ss:$8 sps:$4 sm:$0xff]  }
 0x2bf   : > { %v1376_v8 = vadd.f32 %v1375_v14, %v3990_v9  ;;  %v1489_v17 = vadd.f32 %v1488_v15, %v3992_v10  ;;  %v1377_v38 = vpop.f32.mrb[31].mxu0  ;;  %v1490_v19 = vpop.f32.mrb[47].mxu1  ;;  %2078 = vmatmul.mubr.bf16.gmra.mrb[56].mxu0 %v1605_v60  ;;  %v1557_v24 = vmax.f32 %v1372_v2, 0.0  ;;  %v1559_v25 = vmax.f32 %v1485_v3, 0.0  ;;  %v3394_v3 = vld [vmem:[%s4378_s7 + $0x184] ss:$8 sps:$4 sm:$0xff]  }
 0x2c0   : > { %v1378_v20 = vadd.f32 %v1377_v38, %v3995_v11  ;;  %v1491_v22 = vadd.f32 %v1490_v19, %v3997_v12  ;;  %2147 = vmatpush1.bf16.msra.mxu0 %v3380_v44  ;;  %v1558_v29 = vmax.f32 %v1374_v7, 0.0  ;;  %v1560_v30 = vmax.f32 %v1487_v13, 0.0  ;;  %v3392_v38 = vld [vmem:[%s4378_s7 + $0x180] ss:$8 sps:$4 sm:$0xff]  }
 0x2c1   : > { %v1561_v26 = vmax.f32 %v1376_v8, 0.0  ;;  %v1563_v27 = vmax.f32 %v1489_v17, 0.0  ;;  %2148 = vmatprep.subr.bf16.mxu0 %v3385_v6 }
 0x2c2   : > { %v1562_v42 = vmax.f32 %v1378_v20, 0.0  ;;  %v1564_v31 = vmax.f32 %v1491_v22, 0.0 }
 0x2c3   : > { %v1609_v32 = vpack.c.bf16 %v1561_v26, %v1557_v24  ;;  %v4121_v33 = vpack.c.bf16 %v1563_v27, %v1559_v25  ;;  %v3397_v24 = vld [vmem:[%s4378_s7 + $0x194] ss:$8 sps:$4 sm:$0xff]  }
 0x2c4   : > { %v1610_v34 = vpack.c.bf16 %v1562_v42, %v1558_v29  ;;  %v4123_v35 = vpack.c.bf16 %v1564_v31, %v1560_v30  ;;  %2149 = vmatpush1.bf16.msra.mxu0 %v3383_v23  ;;  %v1381_v36 = vpop.f32.mrb[32].mxu0  ;;  %v1494_v37 = vpop.f32.mrb[48].mxu1 }
 0x2c5   : > { %v1382_v46 = vadd.f32 %v1381_v36, %v3990_v9  ;;  %v1495_v47 = vadd.f32 %v1494_v37, %v3992_v10  ;;  %v1383_v49 = vpop.f32.mrb[33].mxu0  ;;  %v1496_v50 = vpop.f32.mrb[49].mxu1  ;;  %2150 = vmatprep.subr.bf16.mxu0 %v3388_v28  ;;  %v3395_v36 = vld [vmem:[%s4378_s7 + $0x190] ss:$8 sps:$4 sm:$0xff]  }
 0x2c6   : > { %v1384_v52 = vadd.f32 %v1383_v49, %v3995_v11  ;;  %v1497_v53 = vadd.f32 %v1496_v50, %v3997_v12  ;;  %v1385_v54 = vpop.f32.mrb[34].mxu0  ;;  %v1498_v55 = vpop.f32.mrb[50].mxu1  ;;  %2087 = vmatprep.mubr.bf16.mxu0 %v1610_v34  ;;  %v3400_v49 = vld [vmem:[%s4378_s7 + $0x1a4] ss:$8 sps:$4 sm:$0xff]  }
 0x2c7   : > { %v1386_v56 = vadd.f32 %v1385_v54, %v3990_v9  ;;  %v1499_v57 = vadd.f32 %v1498_v55, %v3992_v10  ;;  %v1387_v58 = vpop.f32.mrb[35].mxu0  ;;  %v1500_v59 = vpop.f32.mrb[51].mxu1  ;;  %2088 = vmatmul.mubr.bf16.gmra.mrb[60].mxu0 %v1609_v32  ;;  %v1565_v1 = vmax.f32 %v1382_v46, 0.0  ;;  %v1567_v43 = vmax.f32 %v1495_v47, 0.0 }
 0x2c8   : > { %v1388_v60 = vadd.f32 %v1387_v58, %v3995_v11  ;;  %v1501_v62 = vadd.f32 %v1500_v59, %v3997_v12  ;;  %2151 = vmatpush1.bf16.msra.mxu0 %v3386_v40  ;;  %v1566_v4 = vmax.f32 %v1384_v52, 0.0  ;;  %v1568_v5 = vmax.f32 %v1497_v53, 0.0 }
 0x2c9   : > { %v1569_v44 = vmax.f32 %v1386_v56, 0.0  ;;  %v1571_v2 = vmax.f32 %v1499_v57, 0.0  ;;  %2152 = vmatprep.subr.bf16.mxu0 %v3391_v51 }
 0x2ca   : > { %v1570_v6 = vmax.f32 %v1388_v60, 0.0  ;;  %v1572_v7 = vmax.f32 %v1501_v62, 0.0  ;;  %v3398_v60 = vld [vmem:[%s4378_s7 + $0x1a0] ss:$8 sps:$4 sm:$0xff]  }
 0x2cb   : > { %v1613_v13 = vpack.c.bf16 %v1569_v44, %v1565_v1  ;;  %v4145_v14 = vpack.c.bf16 %v1571_v2, %v1567_v43  ;;  %v3403_v44 = vld [vmem:[%s4378_s7 + $0x1b4] ss:$8 sps:$4 sm:$0xff]  }
 0x2cc   : > { %v1614_v15 = vpack.c.bf16 %v1570_v6, %v1566_v4  ;;  %v4147_v16 = vpack.c.bf16 %v1572_v7, %v1568_v5  ;;  %2153 = vmatpush1.bf16.msra.mxu0 %v3389_v63  ;;  %v1391_v8 = vpop.f32.mrb[36].mxu0  ;;  %v1504_v17 = vpop.f32.mrb[52].mxu1 }
 0x2cd   : > { %v1392_v19 = vadd.f32 %v1391_v8, %v3990_v9  ;;  %v1505_v20 = vadd.f32 %v1504_v17, %v3992_v10  ;;  %v1393_v22 = vpop.f32.mrb[37].mxu0  ;;  %v1506_v23 = vpop.f32.mrb[53].mxu1  ;;  %2154 = vmatprep.subr.bf16.mxu0 %v3394_v3 }
 0x2ce   : > { %v1394_v25 = vadd.f32 %v1393_v22, %v3995_v11  ;;  %v1507_v26 = vadd.f32 %v1506_v23, %v3997_v12  ;;  %v1395_v27 = vpop.f32.mrb[38].mxu0  ;;  %v1508_v28 = vpop.f32.mrb[54].mxu1  ;;  %2097 = vmatprep.mubr.bf16.mxu0 %v1614_v15 }
 0x2cf   : > { %v1396_v29 = vadd.f32 %v1395_v27, %v3990_v9  ;;  %v1509_v30 = vadd.f32 %v1508_v28, %v3992_v10  ;;  %v1397_v42 = vpop.f32.mrb[39].mxu0  ;;  %v1510_v31 = vpop.f32.mrb[55].mxu1  ;;  %2098 = vmatmul.mubr.bf16.gmra.mrb[64].mxu0 %v1613_v13  ;;  %v1573_v37 = vmax.f32 %v1392_v19, 0.0  ;;  %v1575_v40 = vmax.f32 %v1505_v20, 0.0 }
 0x2d0   : > { %v1398_v32 = vadd.f32 %v1397_v42, %v3995_v11  ;;  %v1511_v34 = vadd.f32 %v1510_v31, %v3997_v12  ;;  %2155 = vmatpush1.bf16.msra.mxu0 %v3392_v38  ;;  %v1574_v50 = vmax.f32 %v1394_v25, 0.0  ;;  %v1576_v51 = vmax.f32 %v1507_v26, 0.0  ;;  %v3401_v38 = vld [vmem:[%s4378_s7 + $0x1b0] ss:$8 sps:$4 sm:$0xff]  }
 0x2d1   : > { %v1577_v46 = vmax.f32 %v1396_v29, 0.0  ;;  %v1579_v47 = vmax.f32 %v1509_v30, 0.0  ;;  %2156 = vmatprep.subr.bf16.mxu0 %v3397_v24  ;;  %v3406_v24 = vld [vmem:[%s4378_s7 + $0x1c4] ss:$8 sps:$4 sm:$0xff]  }
 0x2d2   : > { %v1578_v52 = vmax.f32 %v1398_v32, 0.0  ;;  %v1580_v53 = vmax.f32 %v1511_v34, 0.0 }
 0x2d3   : > { %v1617_v54 = vpack.c.bf16 %v1577_v46, %v1573_v37  ;;  %v4169_v55 = vpack.c.bf16 %v1579_v47, %v1575_v40 }
 0x2d4   : > { %v1618_v56 = vpack.c.bf16 %v1578_v52, %v1574_v50  ;;  %v4171_v57 = vpack.c.bf16 %v1580_v53, %v1576_v51  ;;  %2157 = vmatpush1.bf16.msra.mxu0 %v3395_v36  ;;  %v1401_v58 = vpop.f32.mrb[40].mxu0  ;;  %v1514_v59 = vpop.f32.mrb[56].mxu1  ;;  %v3404_v36 = vld [vmem:[%s4378_s7 + $0x1c0] ss:$8 sps:$4 sm:$0xff]  }
 0x2d5   : > { %v1402_v62 = vadd.f32 %v1401_v58, %v3990_v9  ;;  %v1515_v63 = vadd.f32 %v1514_v59, %v3992_v10  ;;  %v1403_v1 = vpop.f32.mrb[41].mxu0  ;;  %v1516_v43 = vpop.f32.mrb[57].mxu1  ;;  %2158 = vmatprep.subr.bf16.mxu0 %v3400_v49  ;;  %v3409_v49 = vld [vmem:[%s4378_s7 + $0x1d4] ss:$8 sps:$4 sm:$0xff]  }
 0x2d6   : > { %v1404_v2 = vadd.f32 %v1403_v1, %v3995_v11  ;;  %v1517_v3 = vadd.f32 %v1516_v43, %v3997_v12  ;;  %v1405_v4 = vpop.f32.mrb[42].mxu0  ;;  %v1518_v5 = vpop.f32.mrb[58].mxu1  ;;  %2107 = vmatprep.mubr.bf16.mxu0 %v1618_v56 }
 0x2d7   : > { %v1406_v6 = vadd.f32 %v1405_v4, %v3990_v9  ;;  %v1519_v7 = vadd.f32 %v1518_v5, %v3992_v10  ;;  %v1407_v13 = vpop.f32.mrb[43].mxu0  ;;  %v1520_v15 = vpop.f32.mrb[59].mxu1  ;;  %2108 = vmatmul.mubr.bf16.gmra.mrb[68].mxu0 %v1617_v54  ;;  %v1581_v19 = vmax.f32 %v1402_v62, 0.0  ;;  %v1583_v20 = vmax.f32 %v1515_v63, 0.0  ;;  %v3407_v63 = vld [vmem:[%s4378_s7 + $0x1d0] ss:$8 sps:$4 sm:$0xff]  }
 0x2d8   : > { %v1408_v8 = vadd.f32 %v1407_v13, %v3995_v11  ;;  %v1521_v17 = vadd.f32 %v1520_v15, %v3997_v12  ;;  %2159 = vmatpush1.bf16.msra.mxu0 %v3398_v60  ;;  %v1582_v25 = vmax.f32 %v1404_v2, 0.0  ;;  %v1584_v26 = vmax.f32 %v1517_v3, 0.0  ;;  %v3410_v13 = vld [vmem:[%s4378_s7 + $0x1e0] ss:$8 sps:$4 sm:$0xff]   ;;  %v3415_v15 = vld [vmem:[%s4378_s7 + $0x1f4] ss:$8 sps:$4 sm:$0xff]  }
 0x2d9   : > { %v1585_v22 = vmax.f32 %v1406_v6, 0.0  ;;  %v1587_v23 = vmax.f32 %v1519_v7, 0.0  ;;  %2160 = vmatprep.subr.bf16.mxu0 %v3403_v44 }
 0x2da   : > { %v1586_v27 = vmax.f32 %v1408_v8, 0.0  ;;  %v1588_v28 = vmax.f32 %v1521_v17, 0.0  ;;  %v3413_v8 = vld [vmem:[%s4378_s7 + $0x1f0] ss:$8 sps:$4 sm:$0xff]  }
 0x2db   : > { %v1621_v29 = vpack.c.bf16 %v1585_v22, %v1581_v19  ;;  %v4193_v30 = vpack.c.bf16 %v1587_v23, %v1583_v20 }
 0x2dc   : > { %v1622_v42 = vpack.c.bf16 %v1586_v27, %v1582_v25  ;;  %v1624_v31 = vpack.c.bf16 %v1588_v28, %v1584_v26  ;;  %2161 = vmatpush1.bf16.msra.mxu0 %v3401_v38  ;;  %v1411_v32 = vpop.f32.mrb[44].mxu0  ;;  %v1524_v34 = vpop.f32.mrb[60].mxu1  ;;  %v3433_v27 = vld [vmem:[%s4382_s11 + $0x8] sm:$0xff]  }
 0x2dd   : > { %v1412_v37 = vadd.f32 %v1411_v32, %v3990_v9  ;;  %v1525_v40 = vadd.f32 %v1524_v34, %v3992_v10  ;;  %v1413_v46 = vpop.f32.mrb[45].mxu0  ;;  %v1526_v47 = vpop.f32.mrb[61].mxu1  ;;  %2162 = vmatprep.subr.bf16.mxu0 %v3406_v24 }
 0x2de   : > { %v1414_v50 = vadd.f32 %v1413_v46, %v3995_v11  ;;  %v1527_v51 = vadd.f32 %v1526_v47, %v3997_v12  ;;  %v1415_v52 = vpop.f32.mrb[46].mxu0  ;;  %v1528_v53 = vpop.f32.mrb[62].mxu1  ;;  %2117 = vmatprep.mubr.bf16.mxu0 %v1622_v42 }
 0x2df   : > { %v1416_v54 = vadd.f32 %v1415_v52, %v3990_v9  ;;  %v1529_v56 = vadd.f32 %v1528_v53, %v3992_v10  ;;  %v1417_v58 = vpop.f32.mrb[47].mxu0  ;;  %v1530_v59 = vpop.f32.mrb[63].mxu1  ;;  %2118 = vmatmul.mubr.bf16.gmra.mrb[72].mxu0 %v1621_v29  ;;  %v1589_v1 = vmax.f32 %v1412_v37, 0.0  ;;  %v1591_v43 = vmax.f32 %v1525_v40, 0.0  ;;  %v3412_v9 = vld [vmem:[%s4378_s7 + $0x1e4] ss:$8 sps:$4 sm:$0xff]  }
 0x2e0   : > { %v1418_v60 = vadd.f32 %v1417_v58, %v3995_v11  ;;  %v1531_v62 = vadd.f32 %v1530_v59, %v3997_v12  ;;  %2163 = vmatpush1.bf16.msra.mxu0 %v3404_v36  ;;  %v1590_v10 = vmax.f32 %v1414_v50, 0.0  ;;  %v1592_v3 = vmax.f32 %v1527_v51, 0.0  ;;  %v3434_v36 = vld [vmem:[%s4382_s11 + $0x10] sm:$0xff]  }
 0x2e1   : > { %v1593_v44 = vmax.f32 %v1416_v54, 0.0  ;;  %v1595_v2 = vmax.f32 %v1529_v56, 0.0  ;;  %2164 = vmatprep.subr.bf16.mxu0 %v3409_v49 }
 0x2e2   : > { %v1594_v4 = vmax.f32 %v1418_v60, 0.0  ;;  %v1596_v11 = vmax.f32 %v1531_v62, 0.0 }
 0x2e3   : > { %v1625_v5 = vpack.c.bf16 %v1593_v44, %v1589_v1  ;;  %v1627_v12 = vpack.c.bf16 %v1595_v2, %v1591_v43 }
 0x2e4   : > { %v1626_v6 = vpack.c.bf16 %v1594_v4, %v1590_v10  ;;  %v1628_v7 = vpack.c.bf16 %v1596_v11, %v1592_v3  ;;  %2165 = vmatpush1.bf16.msra.mxu0 %v3407_v63 }
 0x2e5   : > { %2166 = vmatprep.subr.bf16.mxu0 %v3412_v9 }
 0x2e6   : > { %2127 = vmatprep.mubr.bf16.mxu0 %v1626_v6 }
 0x2e7   : > { %2128 = vmatmul.mubr.bf16.gmra.mrb[76].mxu0 %v1625_v5 }
 0x2e8   : > { %2167 = vmatpush1.bf16.msra.mxu0 %v3410_v13  ;;  %2170 = vmatprep.mubr.bf16.mxu0 %v4024_v48  ;;  %v3431_v48 = vld [vmem:[%s4380_s9 + $0x38] sm:$0xff]  }
 0x2e9   : > { %2168 = vmatprep.subr.bf16.mxu0 %v3415_v15 }
 0x2ec   : > { %2169 = vmatpush1.bf16.msra.mxu0 %v3413_v8 }
 0x2ef   : > { %2171 = vmatmul.mubr.bf16.vlgmr.msra.gmra.mrb[48].mxu0 %v4019_v45  ;;  %v3430_v45 = vld [vmem:[%s4380_s9 + $0x78] sm:$0xff]  }
 0x2f0   : > { %2180 = vmatprep.mubr.bf16.mxu0 %v4060_v21  ;;  %3010 = vmatprep.subr.bf16.mxu1 %v3430_v45  ;;  %v1693_v21 = vld [vmem:[%s4379_s8] sm:$0x3] }
 0x2f1   : > { %3011 = vmatpush3.bf16.msra.mxu1 %v3431_v48 }
 0x2f7   : > { %2181 = vmatmul.mubr.bf16.gmra.mrb[52].mxu0 %v4055_v18  ;;  %v3432_v18 = vld [vmem:[%s4382_s11] sm:$0xff]  }
 0x2f8   : > { %2190 = vmatprep.mubr.bf16.mxu0 %v4096_v0  ;;  %3094 = vmatprep.subr.bf16.mxu1 %v3432_v18  ;;  %v4253_v0 = vrot.slane %v1693_v21, %v3848_v41 }
 0x2ff   : > { %2191 = vmatmul.mubr.bf16.gmra.mrb[56].mxu0 %v4091_v61  ;;  %v4250_v61 = vrot.slane %v1693_v21, %v3842_v39 }
 0x300   : > { %2200 = vmatprep.mubr.bf16.mxu0 %v4123_v35 }
 0x307   : > { %2201 = vmatmul.mubr.bf16.gmra.mrb[60].mxu0 %v4121_v33 }
 0x308   : > { %2210 = vmatprep.mubr.bf16.mxu0 %v4147_v16 }
 0x30f   : > { %2211 = vmatmul.mubr.bf16.gmra.mrb[64].mxu0 %v4145_v14 }
 0x310   : > { %2220 = vmatprep.mubr.bf16.mxu0 %v4171_v57 }
 0x317   : > { %2221 = vmatmul.mubr.bf16.gmra.mrb[68].mxu0 %v4169_v55 }
 0x318   : > { %2230 = vmatprep.mubr.bf16.mxu0 %v1624_v31 }
 0x31f   : > { %2231 = vmatmul.mubr.bf16.gmra.mrb[72].mxu0 %v4193_v30 }
 0x320   : > { %2240 = vmatprep.mubr.bf16.mxu0 %v1628_v7 }
 0x327   : > { %2241 = vmatmul.mubr.bf16.gmra.mrb[76].mxu0 %v1627_v12 }
 0x3c2   : > { %v2172_v33 = vpop.f32.mrb[48].mxu0 }
 0x3c3   : > { %v3126_v35 = vadd.f32 %v2172_v33, %v4250_v61  ;;  %v2174_v14 = vpop.f32.mrb[49].mxu0 }
 0x3c4   : > { %v3127_v16 = vadd.f32 %v2174_v14, %v4253_v0  ;;  %v2176_v55 = vpop.f32.mrb[50].mxu0 }
 0x3c5   : > { %v3128_v57 = vadd.f32 %v2176_v55, %v4250_v61  ;;  %v2178_v17 = vpop.f32.mrb[51].mxu0  ;;  %v2251_v19 = vmax.f32 %v3126_v35, 0.0 }
 0x3c6   : > { %v3129_v38 = vadd.f32 %v2178_v17, %v4253_v0  ;;  %v2252_v22 = vmax.f32 %v3127_v16, 0.0 }
 0x3c7   : > { %v2253_v20 = vmax.f32 %v3128_v57, 0.0 }
 0x3c8   : > { %v2254_v39 = vmax.f32 %v3129_v38, 0.0 }
 0x3c9   : > { %v2283_v23 = vpack.c.bf16 %v2253_v20, %v2251_v19 }
 0x3ca   : > { %v2284_v24 = vpack.c.bf16 %v2254_v39, %v2252_v22  ;;  %v2182_v41 = vpop.f32.mrb[52].mxu0 }
 0x3cb   : > { %v3130_v25 = vadd.f32 %v2182_v41, %v4250_v61  ;;  %v2184_v26 = vpop.f32.mrb[53].mxu0 }
 0x3cc   : > { %v3131_v28 = vadd.f32 %v2184_v26, %v4253_v0  ;;  %v2186_v29 = vpop.f32.mrb[54].mxu0  ;;  %2466 = vmatprep.mubr.bf16.mxu1 %v2284_v24 }
 0x3cd   : > { %v3132_v30 = vadd.f32 %v2186_v29, %v4250_v61  ;;  %v2188_v42 = vpop.f32.mrb[55].mxu0  ;;  %2467 = vmatmul.mubr.bf16.vlgmr.msra.gmra.mrb[64].mxu1 %v2283_v23  ;;  %v2255_v32 = vmax.f32 %v3130_v25, 0.0 }
 0x3ce   : > { %v3133_v31 = vadd.f32 %v2188_v42, %v4253_v0  ;;  %3095 = vmatpush3.bf16.msra.mxu1 %v3432_v18  ;;  %v2256_v37 = vmax.f32 %v3131_v28, 0.0 }
 0x3cf   : > { %v2257_v34 = vmax.f32 %v3132_v30, 0.0  ;;  %3096 = vmatprep.subr.bf16.mxu1 %v3433_v27 }
 0x3d0   : > { %v2258_v40 = vmax.f32 %v3133_v31, 0.0 }
 0x3d1   : > { %v2285_v46 = vpack.c.bf16 %v2257_v34, %v2255_v32 }
 0x3d2   : > { %v2286_v47 = vpack.c.bf16 %v2258_v40, %v2256_v37  ;;  %v2192_v49 = vpop.f32.mrb[56].mxu0  ;;  %3097 = vmatpush3.bf16.msra.mxu1 %v3433_v27 }
 0x3d3   : > { %v3134_v50 = vadd.f32 %v2192_v49, %v4250_v61  ;;  %v2194_v51 = vpop.f32.mrb[57].mxu0  ;;  %3098 = vmatprep.subr.bf16.mxu1 %v3434_v36 }
 0x3d4   : > { %v3135_v52 = vadd.f32 %v2194_v51, %v4253_v0  ;;  %v2196_v53 = vpop.f32.mrb[58].mxu0  ;;  %2474 = vmatprep.mubr.bf16.mxu1 %v2286_v47 }
 0x3d5   : > { %v3136_v54 = vadd.f32 %v2196_v53, %v4250_v61  ;;  %v2198_v56 = vpop.f32.mrb[59].mxu0  ;;  %2475 = vmatmul.mubr.bf16.gmra.mrb[68].mxu1 %v2285_v46  ;;  %v2259_v59 = vmax.f32 %v3134_v50, 0.0 }
 0x3d6   : > { %v3137_v58 = vadd.f32 %v2198_v56, %v4253_v0  ;;  %3099 = vmatpush3.bf16.msra.mxu1 %v3434_v36  ;;  %v2260_v62 = vmax.f32 %v3135_v52, 0.0 }
 0x3d7   : > { %v2261_v60 = vmax.f32 %v3136_v54, 0.0 }
 0x3d8   : > { %v2262_v63 = vmax.f32 %v3137_v58, 0.0 }
 0x3d9   : > { %v2287_v1 = vpack.c.bf16 %v2261_v60, %v2259_v59 }
 0x3da   : > { %v2288_v43 = vpack.c.bf16 %v2262_v63, %v2260_v62  ;;  %v2202_v44 = vpop.f32.mrb[60].mxu0 }
 0x3db   : > { %v3138_v2 = vadd.f32 %v2202_v44, %v4250_v61  ;;  %v2204_v9 = vpop.f32.mrb[61].mxu0 }
 0x3dc   : > { %v3139_v10 = vadd.f32 %v2204_v9, %v4253_v0  ;;  %v2206_v3 = vpop.f32.mrb[62].mxu0  ;;  %2482 = vmatprep.mubr.bf16.mxu1 %v2288_v43 }
 0x3dd   : > { %v3140_v4 = vadd.f32 %v2206_v3, %v4250_v61  ;;  %v2208_v11 = vpop.f32.mrb[63].mxu0  ;;  %2483 = vmatmul.mubr.bf16.gmra.mrb[72].mxu1 %v2287_v1  ;;  %v2263_v12 = vmax.f32 %v3138_v2, 0.0 }
 0x3de   : > { %v3141_v5 = vadd.f32 %v2208_v11, %v4253_v0  ;;  %v2264_v7 = vmax.f32 %v3139_v10, 0.0 }
 0x3df   : > { %v2265_v6 = vmax.f32 %v3140_v4, 0.0 }
 0x3e0   : > { %v2266_v13 = vmax.f32 %v3141_v5, 0.0 }
 0x3e1   : > { %v2289_v15 = vpack.c.bf16 %v2265_v6, %v2263_v12  ;;  %v3435_v12 = vld [vmem:[%s4382_s11 + $0x18] sm:$0xff]   ;;  %v3438_v6 = vld [vmem:[%s4382_s11 + $0x30] sm:$0xff]  }
 0x3e2   : > { %v2290_v8 = vpack.c.bf16 %v2266_v13, %v2264_v7  ;;  %v2212_v45 = vpop.f32.mrb[64].mxu0  ;;  %3100 = vmatprep.subr.bf16.mxu1 %v3435_v12  ;;  %v3439_v7 = vld [vmem:[%s4382_s11 + $0x38] sm:$0xff]  }
 0x3e3   : > { %v3142_v48 = vadd.f32 %v2212_v45, %v4250_v61  ;;  %v2214_v18 = vpop.f32.mrb[65].mxu0  ;;  %3101 = vmatpush3.bf16.msra.mxu1 %v3435_v12 }
 0x3e4   : > { %v3143_v21 = vadd.f32 %v2214_v18, %v4253_v0  ;;  %v2216_v33 = vpop.f32.mrb[66].mxu0  ;;  %2490 = vmatprep.mubr.bf16.mxu1 %v2290_v8 }
 0x3e5   : > { %v3144_v35 = vadd.f32 %v2216_v33, %v4250_v61  ;;  %v2218_v14 = vpop.f32.mrb[67].mxu0  ;;  %2491 = vmatmul.mubr.bf16.gmra.mrb[76].mxu1 %v2289_v15  ;;  %v2267_v55 = vmax.f32 %v3142_v48, 0.0  ;;  %v4311_v15 = vld [vmem:[%s4381_s10] ss:$0 sm:$0xff] }
 0x3e6   : > { %v3145_v16 = vadd.f32 %v2218_v14, %v4253_v0  ;;  %v2268_v17 = vmax.f32 %v3143_v21, 0.0 }
 0x3e7   : > { %v2269_v57 = vmax.f32 %v3144_v35, 0.0 }
 0x3e8   : > { %v2270_v38 = vmax.f32 %v3145_v16, 0.0 }
 0x3e9   : > { %v2291_v19 = vpack.c.bf16 %v2269_v57, %v2267_v55 }
 0x3ea   : > { %v2292_v20 = vpack.c.bf16 %v2270_v38, %v2268_v17  ;;  %v2222_v22 = vpop.f32.mrb[68].mxu0 }
 0x3eb   : > { %v3146_v39 = vadd.f32 %v2222_v22, %v4250_v61  ;;  %v2224_v23 = vpop.f32.mrb[69].mxu0 }
 0x3ec   : > { %v3147_v24 = vadd.f32 %v2224_v23, %v4253_v0  ;;  %v2226_v41 = vpop.f32.mrb[70].mxu0  ;;  %2498 = vmatprep.mubr.bf16.mxu1 %v2292_v20 }
 0x3ed   : > { %v3148_v25 = vadd.f32 %v2226_v41, %v4250_v61  ;;  %v2228_v26 = vpop.f32.mrb[71].mxu0  ;;  %2499 = vmatmul.mubr.bf16.gmra.mrb[80].mxu1 %v2291_v19  ;;  %v2271_v28 = vmax.f32 %v3146_v39, 0.0 }
 0x3ee   : > { %v3149_v27 = vadd.f32 %v2228_v26, %v4253_v0  ;;  %v2272_v30 = vmax.f32 %v3147_v24, 0.0 }
 0x3ef   : > { %v2273_v29 = vmax.f32 %v3148_v25, 0.0 }
 0x3f0   : > { %v2274_v42 = vmax.f32 %v3149_v27, 0.0 }
 0x3f1   : > { %v2293_v31 = vpack.c.bf16 %v2273_v29, %v2271_v28 }
 0x3f2   : > { %v2294_v32 = vpack.c.bf16 %v2274_v42, %v2272_v30  ;;  %v2232_v34 = vpop.f32.mrb[72].mxu0 }
 0x3f3   : > { %v3150_v36 = vadd.f32 %v2232_v34, %v4250_v61  ;;  %v2234_v37 = vpop.f32.mrb[73].mxu0 }
 0x3f4   : > { %v3151_v40 = vadd.f32 %v2234_v37, %v4253_v0  ;;  %v2236_v46 = vpop.f32.mrb[74].mxu0  ;;  %2506 = vmatprep.mubr.bf16.mxu1 %v2294_v32 }
 0x3f5   : > { %v3152_v47 = vadd.f32 %v2236_v46, %v4250_v61  ;;  %v2238_v49 = vpop.f32.mrb[75].mxu0  ;;  %2507 = vmatmul.mubr.bf16.gmra.mrb[84].mxu1 %v2293_v31  ;;  %v2275_v51 = vmax.f32 %v3150_v36, 0.0 }
 0x3f6   : > { %v3153_v50 = vadd.f32 %v2238_v49, %v4253_v0  ;;  %v2276_v53 = vmax.f32 %v3151_v40, 0.0 }
 0x3f7   : > { %v2277_v52 = vmax.f32 %v3152_v47, 0.0 }
 0x3f8   : > { %v2278_v54 = vmax.f32 %v3153_v50, 0.0 }
 0x3f9   : > { %v2295_v56 = vpack.c.bf16 %v2277_v52, %v2275_v51 }
 0x3fa   : > { %v2296_v58 = vpack.c.bf16 %v2278_v54, %v2276_v53  ;;  %v2242_v59 = vpop.f32.mrb[76].mxu0 }
 0x3fb   : > { %v3154_v60 = vadd.f32 %v2242_v59, %v4250_v61  ;;  %v2244_v62 = vpop.f32.mrb[77].mxu0 }
 0x3fc   : > { %v3155_v63 = vadd.f32 %v2244_v62, %v4253_v0  ;;  %v2246_v1 = vpop.f32.mrb[78].mxu0  ;;  %2514 = vmatprep.mubr.bf16.mxu1 %v2296_v58 }
 0x3fd   : > { %v3156_v43 = vadd.f32 %v2246_v1, %v4250_v61  ;;  %v2248_v44 = vpop.f32.mrb[79].mxu0  ;;  %2515 = vmatmul.mubr.bf16.gmra.mrb[88].mxu1 %v2295_v56  ;;  %v2279_v9 = vmax.f32 %v3154_v60, 0.0  ;;  %v3436_v61 = vld [vmem:[%s4382_s11 + $0x20] sm:$0xff]  }
 0x3fe   : > { %v3157_v2 = vadd.f32 %v2248_v44, %v4253_v0  ;;  %v2280_v3 = vmax.f32 %v3155_v63, 0.0  ;;  %3102 = vmatprep.subr.bf16.mxu1 %v3436_v61  ;;  %v3437_v0 = vld [vmem:[%s4382_s11 + $0x28] sm:$0xff]  }
 0x3ff   : > { %v2281_v10 = vmax.f32 %v3156_v43, 0.0  ;;  %3103 = vmatpush3.bf16.msra.mxu1 %v3436_v61 }
 0x400   : > { %v2282_v4 = vmax.f32 %v3157_v2, 0.0  ;;  %3104 = vmatprep.subr.bf16.mxu1 %v3437_v0 }
 0x401   : > { %v2297_v11 = vpack.c.bf16 %v2281_v10, %v2279_v9 }
 0x402   : > { %v2298_v5 = vpack.c.bf16 %v2282_v4, %v2280_v3 }
 0x403   : > { %3105 = vmatpush3.bf16.msra.mxu1 %v3437_v0 }
 0x404   : > { %2522 = vmatprep.mubr.bf16.mxu1 %v2298_v5  ;;  %3106 = vmatprep.subr.bf16.mxu1 %v3438_v6 }
 0x405   : > { %2523 = vmatmul.mubr.bf16.gmra.mrb[92].mxu1 %v2297_v11 }
 0x407   : > { %3107 = vmatpush3.bf16.msra.mxu1 %v3438_v6 }
 0x408   : > { %3108 = vmatprep.subr.bf16.mxu1 %v3439_v7 }
 0x40b   : > { %3109 = vmatpush3.bf16.msra.mxu1 %v3439_v7 }
 0x4a0   : > { %v3012_v13 = vpop.f32.mrb[64].mxu1 }
 0x4a1   : > { %v3013_v8 = vpop.f32.mrb[65].mxu1 }
 0x4a2   : > { %v3014_v45 = vadd.f32 %v3013_v8, %v3012_v13  ;;  %v3015_v48 = vpop.f32.mrb[66].mxu1 }
 0x4a3   : > { %v3016_v18 = vpop.f32.mrb[67].mxu1 }
 0x4a4   : > { %v2469_v21 = vadd.f32 %v3014_v45, %v4311_v15  ;;  %v3017_v33 = vadd.f32 %v3016_v18, %v3015_v48 }
 0x4a6   : > { %v2472_v35 = vadd.f32 %v3017_v33, %v4311_v15  ;;  %v2531_v14 = vmax.f32 %v2469_v21, 0.0 }
 0x4a8   : > { %v2532_v16 = vmax.f32 %v2472_v35, 0.0  ;;  %v3018_v55 = vpop.f32.mrb[68].mxu1 }
 0x4a9   : > { %v3019_v57 = vpop.f32.mrb[69].mxu1 }
 0x4aa   : > { %v3020_v17 = vadd.f32 %v3019_v57, %v3018_v55  ;;  %v3021_v38 = vpop.f32.mrb[70].mxu1  ;;  %v2547_v19 = vpack.c.bf16 %v2532_v16, %v2531_v14 }
 0x4ab   : > { %v3022_v20 = vpop.f32.mrb[71].mxu1 }
 0x4ac   : > { %v2477_v22 = vadd.f32 %v3020_v17, %v4311_v15  ;;  %v3023_v39 = vadd.f32 %v3022_v20, %v3021_v38  ;;  %3110 = vmatprep.mubr.bf16.mxu1 %v2547_v19 }
 0x4ae   : > { %v2480_v23 = vadd.f32 %v3023_v39, %v4311_v15  ;;  %v2533_v24 = vmax.f32 %v2477_v22, 0.0 }
 0x4b0   : > { %v2534_v41 = vmax.f32 %v2480_v23, 0.0  ;;  %v3024_v25 = vpop.f32.mrb[72].mxu1 }
 0x4b1   : > { %v3025_v26 = vpop.f32.mrb[73].mxu1 }
 0x4b2   : > { %v2548_v27 = vpack.c.bf16 %v2534_v41, %v2533_v24  ;;  %v3026_v28 = vadd.f32 %v3025_v26, %v3024_v25  ;;  %v3027_v29 = vpop.f32.mrb[74].mxu1 }
 0x4b3   : > { %v3028_v30 = vpop.f32.mrb[75].mxu1 }
 0x4b4   : > { %v2485_v42 = vadd.f32 %v3026_v28, %v4311_v15  ;;  %v3029_v31 = vadd.f32 %v3028_v30, %v3027_v29  ;;  %3111 = vmatmul.mubr.bf16.vlgmr.msra.gmra.mrb[96].mxu1 %v2548_v27  ;;  %v2976_v29 = vld [vmem:[#allocation2] ss:$0 sm:$0xff] }
 0x4b6   : > { %v2488_v32 = vadd.f32 %v3029_v31, %v4311_v15  ;;  %v2535_v34 = vmax.f32 %v2485_v42, 0.0 }
 0x4b8   : > { %v2536_v36 = vmax.f32 %v2488_v32, 0.0  ;;  %v3030_v37 = vpop.f32.mrb[76].mxu1 }
 0x4b9   : > { %v3031_v40 = vpop.f32.mrb[77].mxu1 }
 0x4ba   : > { %v3032_v46 = vadd.f32 %v3031_v40, %v3030_v37  ;;  %v3033_v47 = vpop.f32.mrb[78].mxu1  ;;  %v2549_v49 = vpack.c.bf16 %v2536_v36, %v2535_v34 }
 0x4bb   : > { %v3034_v50 = vpop.f32.mrb[79].mxu1 }
 0x4bc   : > { %v2493_v51 = vadd.f32 %v3032_v46, %v4311_v15  ;;  %v3035_v52 = vadd.f32 %v3034_v50, %v3033_v47  ;;  %3114 = vmatprep.mubr.bf16.mxu1 %v2549_v49 }
 0x4be   : > { %v2496_v53 = vadd.f32 %v3035_v52, %v4311_v15  ;;  %v2537_v54 = vmax.f32 %v2493_v51, 0.0 }
 0x4c0   : > { %v2538_v56 = vmax.f32 %v2496_v53, 0.0  ;;  %v3036_v58 = vpop.f32.mrb[80].mxu1 }
 0x4c1   : > { %v3037_v59 = vpop.f32.mrb[81].mxu1 }
 0x4c2   : > { %v3038_v60 = vadd.f32 %v3037_v59, %v3036_v58  ;;  %v3039_v62 = vpop.f32.mrb[82].mxu1  ;;  %v2550_v63 = vpack.c.bf16 %v2538_v56, %v2537_v54 }
 0x4c3   : > { %v3040_v1 = vpop.f32.mrb[83].mxu1 }
 0x4c4   : > { %v2501_v43 = vadd.f32 %v3038_v60, %v4311_v15  ;;  %v3041_v44 = vadd.f32 %v3040_v1, %v3039_v62  ;;  %3115 = vmatmul.mubr.bf16.gmra.mrb[100].mxu1 %v2550_v63 }
 0x4c6   : > { %v2504_v2 = vadd.f32 %v3041_v44, %v4311_v15  ;;  %v2539_v9 = vmax.f32 %v2501_v43, 0.0 }
 0x4c8   : > { %v2540_v10 = vmax.f32 %v2504_v2, 0.0  ;;  %v3042_v3 = vpop.f32.mrb[84].mxu1 }
 0x4c9   : > { %v3043_v4 = vpop.f32.mrb[85].mxu1 }
 0x4ca   : > { %v3044_v11 = vadd.f32 %v3043_v4, %v3042_v3  ;;  %v3045_v5 = vpop.f32.mrb[86].mxu1  ;;  %v2551_v12 = vpack.c.bf16 %v2540_v10, %v2539_v9 }
 0x4cb   : > { %v3046_v61 = vpop.f32.mrb[87].mxu1 }
 0x4cc   : > { %v2509_v0 = vadd.f32 %v3044_v11, %v4311_v15  ;;  %v3047_v6 = vadd.f32 %v3046_v61, %v3045_v5  ;;  %3118 = vmatprep.mubr.bf16.mxu1 %v2551_v12 }
 0x4ce   : > { %v2512_v7 = vadd.f32 %v3047_v6, %v4311_v15  ;;  %v2541_v13 = vmax.f32 %v2509_v0, 0.0 }
 0x4d0   : > { %v2542_v8 = vmax.f32 %v2512_v7, 0.0  ;;  %v3048_v45 = vpop.f32.mrb[88].mxu1 }
 0x4d1   : > { %v3049_v48 = vpop.f32.mrb[89].mxu1 }
 0x4d2   : > { %v3050_v18 = vadd.f32 %v3049_v48, %v3048_v45  ;;  %v3051_v21 = vpop.f32.mrb[90].mxu1  ;;  %v2552_v33 = vpack.c.bf16 %v2542_v8, %v2541_v13 }
 0x4d3   : > { %v3052_v35 = vpop.f32.mrb[91].mxu1 }
 0x4d4   : > { %v2517_v14 = vadd.f32 %v3050_v18, %v4311_v15  ;;  %v3053_v16 = vadd.f32 %v3052_v35, %v3051_v21  ;;  %3119 = vmatmul.mubr.bf16.gmra.mrb[104].mxu1 %v2552_v33 }
 0x4d6   : > { %v2520_v55 = vadd.f32 %v3053_v16, %v4311_v15  ;;  %v2543_v57 = vmax.f32 %v2517_v14, 0.0 }
 0x4d8   : > { %v2544_v17 = vmax.f32 %v2520_v55, 0.0  ;;  %v3054_v38 = vpop.f32.mrb[92].mxu1 }
 0x4d9   : > { %v3055_v19 = vpop.f32.mrb[93].mxu1 }
 0x4da   : > { %v3056_v20 = vadd.f32 %v3055_v19, %v3054_v38  ;;  %v3057_v22 = vpop.f32.mrb[94].mxu1  ;;  %v2553_v39 = vpack.c.bf16 %v2544_v17, %v2543_v57 }
 0x4db   : > { %v3058_v23 = vpop.f32.mrb[95].mxu1 }
 0x4dc   : > { %v2525_v24 = vadd.f32 %v3056_v20, %v4311_v15  ;;  %v3059_v41 = vadd.f32 %v3058_v23, %v3057_v22  ;;  %3122 = vmatprep.mubr.bf16.mxu1 %v2553_v39 }
 0x4de   : > { %v2528_v25 = vadd.f32 %v3059_v41, %v4311_v15  ;;  %v2545_v26 = vmax.f32 %v2525_v24, 0.0 }
 0x4e0   : > { %v2546_v27 = vmax.f32 %v2528_v25, 0.0 }
 0x4e2   : > { %v2554_v28 = vpack.c.bf16 %v2546_v27, %v2545_v26 }
 0x4e4   : > { %3123 = vmatmul.mubr.bf16.gmra.mrb[108].mxu1 %v2554_v28 }
 0x587   : > { %v3112_v30 = vpop.f32.mrb[96].mxu1 }
 0x588   : > { %v2669_v42 = vadd.f32 %v3112_v30, %v2976_v29  ;;  %v2660_v15 = vpop.f32.mrb[97].mxu1 }
 0x589   : > { %v2661_v31 = vadd.f32 %v2976_v29, %v2660_v15  ;;  %v3113_v32 = vpop.f32.mrb[98].mxu1 }
 0x58a   : > { %2726 = vst.msk [vmem:[%s4334_s20 + $0x10] sm:$0xff] %vm2723_vm1, %v2669_v42  ;;  %v2672_v34 = vadd.f32 %v3113_v32, %v2976_v29  ;;  %v2663_v36 = vpop.f32.mrb[99].mxu1 }
 0x58b   : > { %2724 = vst.msk [vmem:[%s4334_s20] sm:$0xff] %vm2723_vm1, %v2661_v31  ;;  %v2664_v37 = vadd.f32 %v2976_v29, %v2663_v36 }
 0x58c   : > { %2727 = vst.msk [vmem:[%s4334_s20 + $0x18] sm:$0xff] %vm2723_vm1, %v2672_v34 }
 0x58d   : > { %2725 = vst.msk [vmem:[%s4334_s20 + $0x8] sm:$0xff] %vm2723_vm1, %v2664_v37 }
 0x597   : > { %v3116_v40 = vpop.f32.mrb[100].mxu1 }
 0x598   : > { %v2685_v46 = vadd.f32 %v3116_v40, %v2976_v29  ;;  %v2676_v47 = vpop.f32.mrb[101].mxu1 }
 0x599   : > { %v2677_v49 = vadd.f32 %v2976_v29, %v2676_v47  ;;  %v3117_v50 = vpop.f32.mrb[102].mxu1 }
 0x59a   : > { %2730 = vst.msk [vmem:[%s4334_s20 + $0x30] sm:$0xff] %vm2723_vm1, %v2685_v46  ;;  %v2688_v51 = vadd.f32 %v3117_v50, %v2976_v29  ;;  %v2679_v52 = vpop.f32.mrb[103].mxu1 }
 0x59b   : > { %2728 = vst.msk [vmem:[%s4334_s20 + $0x20] sm:$0xff] %vm2723_vm1, %v2677_v49  ;;  %v2680_v53 = vadd.f32 %v2976_v29, %v2679_v52 }
 0x59c   : > { %2731 = vst.msk [vmem:[%s4334_s20 + $0x38] sm:$0xff] %vm2723_vm1, %v2688_v51 }
 0x59d   : > { %2729 = vst.msk [vmem:[%s4334_s20 + $0x28] sm:$0xff] %vm2723_vm1, %v2680_v53 }
 0x5a7   : > { %v3120_v54 = vpop.f32.mrb[104].mxu1 }
 0x5a8   : > { %v2701_v56 = vadd.f32 %v3120_v54, %v2976_v29  ;;  %v2692_v58 = vpop.f32.mrb[105].mxu1 }
 0x5a9   : > { %v2693_v59 = vadd.f32 %v2976_v29, %v2692_v58  ;;  %v3121_v60 = vpop.f32.mrb[106].mxu1 }
 0x5aa   : > { %2734 = vst.msk [vmem:[%s4334_s20 + $0x50] sm:$0xff] %vm2723_vm1, %v2701_v56  ;;  %v2704_v62 = vadd.f32 %v3121_v60, %v2976_v29  ;;  %v2695_v63 = vpop.f32.mrb[107].mxu1 }
 0x5ab   : > { %2732 = vst.msk [vmem:[%s4334_s20 + $0x40] sm:$0xff] %vm2723_vm1, %v2693_v59  ;;  %v2696_v1 = vadd.f32 %v2976_v29, %v2695_v63 }
 0x5ac   : > { %2735 = vst.msk [vmem:[%s4334_s20 + $0x58] sm:$0xff] %vm2723_vm1, %v2704_v62 }
 0x5ad   : > { %2733 = vst.msk [vmem:[%s4334_s20 + $0x48] sm:$0xff] %vm2723_vm1, %v2696_v1 }
 0x5b7   : > { %v3124_v43 = vpop.f32.mrb[108].mxu1 }
 0x5b8   : > { %v2717_v44 = vadd.f32 %v3124_v43, %v2976_v29  ;;  %v2708_v2 = vpop.f32.mrb[109].mxu1 }
 0x5b9   : > { %v2709_v9 = vadd.f32 %v2976_v29, %v2708_v2  ;;  %v3125_v10 = vpop.f32.mrb[110].mxu1 }
 0x5ba   : > { %2738 = vst.msk [vmem:[%s4334_s20 + $0x70] sm:$0xff] %vm2723_vm1, %v2717_v44  ;;  %v2720_v3 = vadd.f32 %v3125_v10, %v2976_v29  ;;  %v2711_v4 = vpop.f32.mrb[111].mxu1 }
 0x5bb   : > { %2736 = vst.msk [vmem:[%s4334_s20 + $0x60] sm:$0xff] %vm2723_vm1, %v2709_v9  ;;  %v2712_v11 = vadd.f32 %v2976_v29, %v2711_v4 }
 0x5bc   : > { %2739 = vst.msk [vmem:[%s4334_s20 + $0x78] sm:$0xff] %vm2723_vm1, %v2720_v3 }
 0x5bd   : > { %2737 = vst.msk [vmem:[%s4334_s20 + $0x68] sm:$0xff] %vm2723_vm1, %v2712_v11 }
 0x5be PF: > { %s25_s27 = sadd.s32 1, %s3446_s27  }
 0x5bf   : > { %p22_p4 = scmp.ge.s32.totalorder %s25_s27, 4  }
 0x5c1   :  { %24 = sbr.rel (!%p22_p4) target bundleno = 3 (0x3), region = 102 }

</bundles_post_ra>
